<compile_context>
chip_gen: v5e
topology: v5e:2x2
jax: 0.10.0
libtpu: 0.0.40
codegen_flags: <defaults>
</compile_context>

<pallas_src>
import jax
import jax.numpy as jnp
from jax import lax
from jax.experimental import pallas as pl
from jax.experimental.pallas import tpu as pltpu

NUM_SEQ = 430                 # hard-coded in PhyChemPPI.__init__
SEQ_H, SEQ_W = 15, 25         # each sequence tile is (1, 15, 25) NCHW in PyTorch
CONV_W = SEQ_W - 1            # 24: conv1 output width per batch row
POOL_W = 21                   # final pooled width per batch row
FC1_IN = 16 * POOL_W          # 336
S_TILE = 56                   # sequences per grid step -> 8 steps
S_PAD = ((NUM_SEQ + S_TILE - 1) // S_TILE) * S_TILE   # 448


# --------------------------- Kernel 1: conv bank --------------------------- #
def _conv_bank_kernel(x2_ref, w1_ref, w2_ref, out_ref):
    # x2_ref:  (S_TILE, 32, B*24) f32  rows 0:16 = x (+ ones row) at kw shift 0,
    #                                  rows 16:32 = same at kw shift +1;
    #                                  columns [b*24, b*24+24) belong to batch b.
    # w1_ref:  (S_TILE, 16, 32)   f32  [conv1 kw0 | bias | kw1 | 0]; row 8 emits a
    #                                  constant-1 channel (carries conv2's bias).
    # w2_ref:  (S_TILE, 16, 32)   f32  [conv2 kw0 | bias | 0 | kw1 | 0]
    # out_ref: (S_TILE, B*16, 21) bf16 pooled conv2 output; row b*16+c, col w holds
    #                                  PyTorch's p2[b, c, w] (flatten order c*21+w).
    B = out_ref.shape[1] // 16
    W = x2_ref.shape[2]                      # B * 24

    def body(s, carry):
        x2 = x2_ref[s]                                                   # (32, W)
        # conv1 + ReLU (bias folded into the augmented ones row).
        h1 = jnp.maximum(
            jnp.dot(w1_ref[s], x2, preferred_element_type=jnp.float32), 0.0)   # (16, W)
        # MaxPool(1, 2) stride 1 (per-batch-segment boundary columns become
        # garbage but are never read by valid outputs).
        p1 = jnp.maximum(h1[:, 0:W - 1], h1[:, 1:W])                     # (16, W-1)
        # conv2 as a single matmul: stack the two shifted slices on sublanes
        # (aligned concat: pieces are 16 rows each).
        x2b = jnp.concatenate([p1[:, 0:W - 2], p1[:, 1:W - 1]], axis=0)  # (32, W-2)
        h2 = jnp.maximum(
            jnp.dot(w2_ref[s], x2b, preferred_element_type=jnp.float32), 0.0)  # (16, W-2)
        p2 = jnp.maximum(h2[:, 0:W - 3], h2[:, 1:W - 2])                 # (16, W-3)
        # Stack valid per-batch segments along sublanes: row b*16+c, 21 lanes.
        p2s = jnp.concatenate(
            [p2[:, b * CONV_W: b * CONV_W + POOL_W] for b in range(B)], axis=0)
        out_ref[s] = p2s.astype(jnp.bfloat16)                            # (B*16, 21)
        return carry

    lax.fori_loop(0, x2_ref.shape[0], body, 0)


def conv_bank(x2, w1p, w2p, B):
    seq3 = lambda i: (i, 0, 0)
    return pl.pallas_call(
        _conv_bank_kernel,
        out_shape=jax.ShapeDtypeStruct((S_PAD, B * 16, POOL_W), jnp.bfloat16),
        grid=(S_PAD // S_TILE,),
        in_specs=[
            pl.BlockSpec((S_TILE, 2 * (SEQ_H + 1), B * CONV_W), seq3),
            pl.BlockSpec((S_TILE, 16, 32), seq3),
            pl.BlockSpec((S_TILE, 16, 32), seq3),
        ],
        out_specs=pl.BlockSpec((S_TILE, B * 16, POOL_W), seq3),
        compiler_params=pltpu.CompilerParams(
            dimension_semantics=("parallel",),
            vmem_limit_bytes=32 * 1024 * 1024),
    )(x2, w1p, w2p)


# ---------------------------- Kernel 2: fc bank ---------------------------- #
def _fc_bank_kernel(act_ref, fc1w_ref, fc1b_ref, fc2w_ref, fc2b_ref,
                    fc3w_ref, fc3b_ref, out_ref):
    # act_ref:  (S_TILE, B, 336)  bf16  (already in PyTorch flatten order)
    # fc1w_ref: (S_TILE, 336, 64) bf16  (PyTorch weight pre-transposed host-side)
    # fc2w_ref: (S_TILE, 10, 64)  f32   (PyTorch layout, trans-B contraction)
    # fc3w_ref: (S_TILE, 2, 10)   f32
    # biases:   (S_TILE, 1, n)    f32
    # out_ref:  (S_TILE, B, 2)    f32
    def body(s, carry):
        f1 = jnp.maximum(
            jnp.dot(act_ref[s], fc1w_ref[s], preferred_element_type=jnp.float32)
            + fc1b_ref[s], 0.0)                                           # (B, 64)
        f2 = jnp.maximum(
            lax.dot_general(f1, fc2w_ref[s], (((1,), (1,)), ((), ())),
                            preferred_element_type=jnp.float32)
            + fc2b_ref[s], 0.0)                                           # (B, 10)
        out_ref[s] = lax.dot_general(
            f2, fc3w_ref[s], (((1,), (1,)), ((), ())),
            preferred_element_type=jnp.float32) + fc3b_ref[s]             # (B, 2)
        return carry

    lax.fori_loop(0, act_ref.shape[0], body, 0)


def fc_bank(act, fc_params, B):
    fc1w, fc1b, fc2w, fc2b, fc3w, fc3b = fc_params
    seq3 = lambda i: (i, 0, 0)
    return pl.pallas_call(
        _fc_bank_kernel,
        out_shape=jax.ShapeDtypeStruct((S_PAD, B, 2), jnp.float32),
        grid=(S_PAD // S_TILE,),
        in_specs=[
            pl.BlockSpec((S_TILE, B, FC1_IN), seq3),
            pl.BlockSpec((S_TILE, FC1_IN, 64), seq3),
            pl.BlockSpec((S_TILE, 1, 64), seq3),
            pl.BlockSpec((S_TILE, 10, 64), seq3),
            pl.BlockSpec((S_TILE, 1, 10), seq3),
            pl.BlockSpec((S_TILE, 2, 10), seq3),
            pl.BlockSpec((S_TILE, 1, 2), seq3),
        ],
        out_specs=pl.BlockSpec((S_TILE, B, 2), seq3),
        compiler_params=pltpu.CompilerParams(
            dimension_semantics=("parallel",),
            vmem_limit_bytes=48 * 1024 * 1024),
    )(act, fc1w, fc1b, fc2w, fc2b, fc3w, fc3b)


# ------------------------------- Head kernel ------------------------------- #
def _head_kernel(x_ref, w1_ref, b1_ref, w2_ref, b2_ref, w3_ref, b3_ref, out_ref):
    # BatchNorm1d (eval) pre-folded into w1/b1 and w2/b2; dropout = identity.
    h = jnp.maximum(jnp.dot(x_ref[...], w1_ref[...],
                            preferred_element_type=jnp.float32) + b1_ref[...], 0.0)
    h = jnp.maximum(jnp.dot(h, w2_ref[...],
                            preferred_element_type=jnp.float32) + b2_ref[...], 0.0)
    out_ref[...] = jnp.dot(h, w3_ref[...],
                           preferred_element_type=jnp.float32) + b3_ref[...]


def head(concat, head_params):
    B = concat.shape[0]
    return pl.pallas_call(
        _head_kernel,
        out_shape=jax.ShapeDtypeStruct((B, 2), jnp.float32),
    )(concat, *head_params)


# ------------------------------ Full forward ------------------------------- #
@jax.jit
def phychem_ppi_forward(X, dc_params, head_params):
    B = X.shape[0]                      # wide-lane conv layout assumes B*24 <= 128
    w1p, w2p, fc1w, fc1b, fc2w, fc2b, fc3w, fc3b = dc_params
    x = X.astype(jnp.float32)                                          # (B, S, 15, 25)
    ones_row = jnp.ones((B, NUM_SEQ, 1, SEQ_W), jnp.float32)
    xa = jnp.concatenate([x, ones_row], axis=2)                        # (B, S, 16, 25)
    # Stack the two conv1 kernel-width shifts on the row axis.
    x2 = jnp.concatenate([xa[..., 0:CONV_W], xa[..., 1:SEQ_W]], axis=2)  # (B, S, 32, 24)
    # Wide-lane layout: per sequence a (32, B*24) matrix, batch segments on lanes.
    x2 = jnp.transpose(x2, (1, 2, 0, 3)).reshape(NUM_SEQ, 2 * (SEQ_H + 1), B * CONV_W)
    x2 = jnp.pad(x2, ((0, S_PAD - NUM_SEQ), (0, 0), (0, 0)))
    p2 = conv_bank(x2, w1p, w2p, B)                    # (S_PAD, B*16, 21) bf16
    # Free row-major reshape: row b*16+c, col w  ->  (s, b, c*21+w) PyTorch flatten.
    act = p2.reshape(S_PAD, B, FC1_IN)
    outs = fc_bank(act, (fc1w, fc1b, fc2w, fc2b, fc3w, fc3b), B)   # (S_PAD, B, 2)
    # torch.cat(outs, dim=1): columns [2i, 2i+1] hold the output of sequence i.
    concat = jnp.transpose(outs[:NUM_SEQ], (1, 0, 2)).reshape(B, 2 * NUM_SEQ)
    return head(concat, head_params)


# --------------------------- Parameter generation --------------------------- #
def init_params(key):
    S = NUM_SEQ
    keys = jax.random.split(key, 24)

    def rnd(k, shape, scale=0.1):
        return scale * jax.random.normal(k, shape, dtype=jnp.float32)

    def q(v):   # values exactly representable in bfloat16 (fc1 weights stored bf16)
        return v.astype(jnp.bfloat16).astype(jnp.float32)

    # Per-sequence DeepCAT parameters in PyTorch layouts.
    conv1_w = rnd(keys[0], (S, 8, 1, 15, 2))        # Conv2d(1, 8, (15, 2)).weight
    conv1_b = rnd(keys[1], (S, 8))
    conv2_w = rnd(keys[2], (S, 16, 8, 1, 2))        # Conv2d(8, 16, (1, 2)).weight
    conv2_b = rnd(keys[3], (S, 16))
    fc1_w = q(rnd(keys[4], (S, 64, FC1_IN)))        # Linear(336, 64).weight (bf16 values)
    fc1_b = rnd(keys[5], (S, 64))
    fc2_w = rnd(keys[6], (S, 10, 64))
    fc2_b = rnd(keys[7], (S, 10))
    fc3_w = rnd(keys[8], (S, 2, 10))
    fc3_b = rnd(keys[9], (S, 2))

    # Head parameters (PyTorch layouts) + BatchNorm1d eval-mode statistics.
    h_fc1_w = rnd(keys[10], (256, 2 * S)); h_fc1_b = rnd(keys[11], (256,))
    h_fc2_w = rnd(keys[12], (8, 256));     h_fc2_b = rnd(keys[13], (8,))
    h_fc3_w = rnd(keys[14], (2, 8));       h_fc3_b = rnd(keys[15], (2,))
    g1 = 1.0 + rnd(keys[16], (256,)); be1 = rnd(keys[17], (256,))
    rm1 = rnd(keys[18], (256,))
    rv1 = jax.random.uniform(keys[19], (256,), minval=0.5, maxval=1.5)
    g2 = 1.0 + rnd(keys[20], (8,)); be2 = rnd(keys[21], (8,))
    rm2 = rnd(keys[22], (8,))
    rv2 = jax.random.uniform(keys[23], (8,), minval=0.5, maxval=1.5)

    ref_params = dict(
        conv1_w=conv1_w, conv1_b=conv1_b, conv2_w=conv2_w, conv2_b=conv2_b,
        fc1_w=fc1_w, fc1_b=fc1_b, fc2_w=fc2_w, fc2_b=fc2_b, fc3_w=fc3_w, fc3_b=fc3_b,
        h_fc1_w=h_fc1_w, h_fc1_b=h_fc1_b, h_fc2_w=h_fc2_w, h_fc2_b=h_fc2_b,
        h_fc3_w=h_fc3_w, h_fc3_b=h_fc3_b,
        g1=g1, be1=be1, rm1=rm1, rv1=rv1, g2=g2, be2=be2, rm2=rm2, rv2=rv2)

    # --- Kernel-side packing ------------------------------------------------ #
    pad = S_PAD - S

    def pad_seq(a):
        return jnp.pad(a, ((0, pad),) + ((0, 0),) * (a.ndim - 1))

    # conv1 pack (16, 32): cols 0:15 = kw0 weights, col 15 = bias (hits the
    # constant-1 input row), cols 16:31 = kw1 weights (col 31 = 0).  Row 8
    # produces a constant-1 channel used as conv2's "ones" input; rows 9:16 = 0.
    w1p = jnp.zeros((S, 16, 32), jnp.float32)
    w1p = w1p.at[:, 0:8, 0:15].set(conv1_w[:, :, 0, :, 0])
    w1p = w1p.at[:, 0:8, 15].set(conv1_b)
    w1p = w1p.at[:, 0:8, 16:31].set(conv1_w[:, :, 0, :, 1])
    w1p = w1p.at[:, 8, 15].set(1.0)
    # conv2 pack (16, 32): input rows = [conv1 channels 0:8 | ones | zeros] at
    # shift 0 (cols 0:16) and the same at shift +1 (cols 16:32).
    w2p = jnp.zeros((S, 16, 32), jnp.float32)
    w2p = w2p.at[:, :, 0:8].set(conv2_w[:, :, :, 0, 0])
    w2p = w2p.at[:, :, 8].set(conv2_b)
    w2p = w2p.at[:, :, 16:24].set(conv2_w[:, :, :, 0, 1])

    dc_params = (
        pad_seq(w1p),                                             # (S_PAD, 16, 32)  f32
        pad_seq(w2p),                                             # (S_PAD, 16, 32)  f32
        pad_seq(jnp.swapaxes(fc1_w, 1, 2)).astype(jnp.bfloat16),  # (S_PAD, 336, 64) bf16
        pad_seq(fc1_b)[:, None, :],                               # (S_PAD, 1, 64)   f32
        pad_seq(fc2_w),                                           # (S_PAD, 10, 64)  f32
        pad_seq(fc2_b)[:, None, :],                               # (S_PAD, 1, 10)   f32
        pad_seq(fc3_w),                                           # (S_PAD, 2, 10)   f32
        pad_seq(fc3_b)[:, None, :],                               # (S_PAD, 1, 2)    f32
    )

    # Head: fold BatchNorm1d (eval) into the Linear layers.
    eps = 1e-5
    s1 = g1 / jnp.sqrt(rv1 + eps); t1 = be1 - rm1 * s1
    s2 = g2 / jnp.sqrt(rv2 + eps); t2 = be2 - rm2 * s2
    head_params = (
        h_fc1_w.T * s1[None, :], (h_fc1_b * s1 + t1)[None, :],
        h_fc2_w.T * s2[None, :], (h_fc2_b * s2 + t2)[None, :],
        h_fc3_w.T, h_fc3_b[None, :],
    )
    return dc_params, head_params, ref_params


# --------------------------- Pure-JAX reference ----------------------------- #
def reference_forward(X, p):
    P = jax.lax.Precision.HIGHEST
    B = X.shape[0]
    x = X.astype(jnp.float32)                                     # (B, S, 15, 25)
    w1a = p['conv1_w'][:, :, 0, :, 0]                             # (S, 8, 15)
    w1b = p['conv1_w'][:, :, 0, :, 1]
    h1 = (jnp.einsum('bshw,sch->bscw', x[..., 0:24], w1a, precision=P)
          + jnp.einsum('bshw,sch->bscw', x[..., 1:25], w1b, precision=P)
          + p['conv1_b'][None, :, :, None])
    h1 = jax.nn.relu(h1)
    p1 = jnp.maximum(h1[..., 0:23], h1[..., 1:24])                # (B, S, 8, 23)
    w2a = p['conv2_w'][:, :, :, 0, 0]                             # (S, 16, 8)
    w2b = p['conv2_w'][:, :, :, 0, 1]
    h2 = (jnp.einsum('bscw,soc->bsow', p1[..., 0:22], w2a, precision=P)
          + jnp.einsum('bscw,soc->bsow', p1[..., 1:23], w2b, precision=P)
          + p['conv2_b'][None, :, :, None])
    h2 = jax.nn.relu(h2)
    p2 = jnp.maximum(h2[..., 0:21], h2[..., 1:22])                # (B, S, 16, 21)
    p2f = p2.reshape(B, NUM_SEQ, FC1_IN)                          # PyTorch flatten
    f1 = jax.nn.relu(jnp.einsum('bsk,sok->bso', p2f, p['fc1_w'], precision=P)
                     + p['fc1_b'][None])
    f2 = jax.nn.relu(jnp.einsum('bsk,sok->bso', f1, p['fc2_w'], precision=P)
                     + p['fc2_b'][None])
    o = jnp.einsum('bsk,sok->bso', f2, p['fc3_w'], precision=P) + p['fc3_b'][None]
    concat = o.reshape(B, 2 * NUM_SEQ)                            # torch.cat(dim=1)
    eps = 1e-5
    z = jnp.dot(concat, p['h_fc1_w'].T, precision=P) + p['h_fc1_b']
    z = (z - p['rm1']) / jnp.sqrt(p['rv1'] + eps) * p['g1'] + p['be1']
    h = jax.nn.relu(z)
    z = jnp.dot(h, p['h_fc2_w'].T, precision=P) + p['h_fc2_b']
    z = (z - p['rm2']) / jnp.sqrt(p['rv2'] + eps) * p['g2'] + p['be2']
    h = jax.nn.relu(z)
    return jnp.dot(h, p['h_fc3_w'].T, precision=P) + p['h_fc3_b']


if __name__ == "__main__":
    key = jax.random.PRNGKey(0)
    pkey, xkey = jax.random.split(key)
    dc_params, head_params, ref_params = init_params(pkey)

    B = 2
    X = jax.random.normal(xkey, (B, NUM_SEQ, SEQ_H, SEQ_W), dtype=jnp.float32)

    out = jax.block_until_ready(phychem_ppi_forward(X, dc_params, head_params))
    assert out.shape == (B, 2), out.shape

    ref = reference_forward(X, ref_params)
    max_err = float(jnp.max(jnp.abs(out - ref)))
    assert max_err < 1e-2, f"mismatch vs reference, max abs err = {max_err}"

    # TODO(synk): Dropout / BatchNorm1d training mode (stochastic masks, batch
    # statistics) are not modeled; eval-mode semantics are implemented.
    print("KERNEL_OK")
</pallas_src>

<mosaic_0001>
module attributes {stable_mosaic.version = 11 : i64} {
  func.func @_conv_bank_kernel(%arg0: i32, %arg1: memref<56x32x48xf32, #tpu.memory_space<vmem>>, %arg2: memref<56x16x32xf32, #tpu.memory_space<vmem>>, %arg3: memref<56x16x32xf32, #tpu.memory_space<vmem>>, %arg4: memref<56x32x21xbf16, #tpu.memory_space<vmem>>) attributes {dimension_semantics = [#tpu.dimension_semantics<parallel>], iteration_bounds = array<i64: 8>, scalar_prefetch = 0 : i64, scratch_operands = 0 : i64, tpu.core_type = #tpu.core_type<tc>, window_params = [{transform_indices = @transform_0, window_bounds = array<i64: 56, 32, 48>}, {transform_indices = @transform_1, window_bounds = array<i64: 56, 16, 32>}, {transform_indices = @transform_2, window_bounds = array<i64: 56, 16, 32>}, {transform_indices = @transform_3, window_bounds = array<i64: 56, 32, 21>}]} {
    %c0_i32 = arith.constant 0 : i32
    %c56_i32 = arith.constant 56 : i32
    %0 = arith.addi %c0_i32, %c56_i32 : i32
    %c1_i32 = arith.constant 1 : i32
    scf.for %arg5 = %c0_i32 to %0 step %c1_i32  : i32 {
      %1 = arith.index_cast %arg5 : i32 to index
      %c0 = arith.constant 0 : index
      %c0_1 = arith.constant 0 : index
      %2 = vector.load %arg1[%1, %c0, %c0_1] : memref<56x32x48xf32, #tpu.memory_space<vmem>>, vector<1x32x48xf32>
      %3 = vector.shape_cast %2 : vector<1x32x48xf32> to vector<32x48xf32>
      %4 = arith.index_cast %arg5 : i32 to index
      %c0_2 = arith.constant 0 : index
      %c0_3 = arith.constant 0 : index
      %5 = vector.load %arg2[%4, %c0_2, %c0_3] : memref<56x16x32xf32, #tpu.memory_space<vmem>>, vector<1x16x32xf32>
      %6 = vector.shape_cast %5 : vector<1x16x32xf32> to vector<16x32xf32>
      %cst = arith.constant dense<0.000000e+00> : vector<16x48xf32>
      %7 = tpu.matmul %6, %3, %cst {dimension_numbers = #tpu.dot_dimension_numbers<[1], [0], [0], [1], [0, 0, 1, 1], [], []>} : vector<16x32xf32>, vector<32x48xf32>, vector<16x48xf32> -> vector<16x48xf32>
      %cst_4 = arith.constant 0.000000e+00 : f32
      %8 = vector.broadcast %cst_4 : f32 to vector<16x48xf32>
      %9 = arith.maximumf %7, %8 : vector<16x48xf32>
      %10 = vector.extract_strided_slice %9 {offsets = [0, 0], sizes = [16, 47], strides = [1, 1]} : vector<16x48xf32> to vector<16x47xf32>
      %11 = vector.extract_strided_slice %9 {offsets = [0, 1], sizes = [16, 47], strides = [1, 1]} : vector<16x48xf32> to vector<16x47xf32>
      %12 = arith.maximumf %10, %11 : vector<16x47xf32>
      %13 = vector.extract_strided_slice %12 {offsets = [0, 0], sizes = [16, 46], strides = [1, 1]} : vector<16x47xf32> to vector<16x46xf32>
      %14 = vector.extract_strided_slice %12 {offsets = [0, 1], sizes = [16, 46], strides = [1, 1]} : vector<16x47xf32> to vector<16x46xf32>
      %15 = tpu.concatenate %13, %14 in 0 : vector<16x46xf32>, vector<16x46xf32> -> vector<32x46xf32>
      %16 = arith.index_cast %arg5 : i32 to index
      %c0_5 = arith.constant 0 : index
      %c0_6 = arith.constant 0 : index
      %17 = vector.load %arg3[%16, %c0_5, %c0_6] : memref<56x16x32xf32, #tpu.memory_space<vmem>>, vector<1x16x32xf32>
      %18 = vector.shape_cast %17 : vector<1x16x32xf32> to vector<16x32xf32>
      %cst_7 = arith.constant dense<0.000000e+00> : vector<16x46xf32>
      %19 = tpu.matmul %18, %15, %cst_7 {dimension_numbers = #tpu.dot_dimension_numbers<[1], [0], [0], [1], [0, 0, 1, 1], [], []>} : vector<16x32xf32>, vector<32x46xf32>, vector<16x46xf32> -> vector<16x46xf32>
      %cst_8 = arith.constant 0.000000e+00 : f32
      %20 = vector.broadcast %cst_8 : f32 to vector<16x46xf32>
      %21 = arith.maximumf %19, %20 : vector<16x46xf32>
      %22 = vector.extract_strided_slice %21 {offsets = [0, 0], sizes = [16, 45], strides = [1, 1]} : vector<16x46xf32> to vector<16x45xf32>
      %23 = vector.extract_strided_slice %21 {offsets = [0, 1], sizes = [16, 45], strides = [1, 1]} : vector<16x46xf32> to vector<16x45xf32>
      %24 = arith.maximumf %22, %23 : vector<16x45xf32>
      %25 = vector.extract_strided_slice %24 {offsets = [0, 0], sizes = [16, 21], strides = [1, 1]} : vector<16x45xf32> to vector<16x21xf32>
      %26 = vector.extract_strided_slice %24 {offsets = [0, 24], sizes = [16, 21], strides = [1, 1]} : vector<16x45xf32> to vector<16x21xf32>
      %27 = tpu.concatenate %25, %26 in 0 : vector<16x21xf32>, vector<16x21xf32> -> vector<32x21xf32>
      %28 = arith.truncf %27 : vector<32x21xf32> to vector<32x21xbf16>
      %29 = arith.index_cast %arg5 : i32 to index
      %c0_9 = arith.constant 0 : index
      %c0_10 = arith.constant 0 : index
      %30 = vector.load %arg4[%29, %c0_9, %c0_10] : memref<56x32x21xbf16, #tpu.memory_space<vmem>>, vector<1x32x21xbf16>
      %31 = vector.shape_cast %30 : vector<1x32x21xbf16> to vector<32x21xbf16>
      %32 = vector.shape_cast %28 : vector<32x21xbf16> to vector<1x32x21xbf16>
      tpu.vector_store %arg4[%29, %c0_9, %c0_10], %32 {strides = array<i32>} : memref<56x32x21xbf16, #tpu.memory_space<vmem>>, vector<1x32x21xbf16>,
    }
    %c56_i32_0 = arith.constant 56 : i32
    return
  }
  func.func @transform_0(%arg0: i32) -> (i32, i32, i32) {
    %c0_i32 = arith.constant 0 : i32
    %c0_i32_0 = arith.constant 0 : i32
    %c0_i32_1 = arith.constant 0 : i32
    return %arg0, %c0_i32, %c0_i32_0 : i32, i32, i32
  }
  func.func @transform_1(%arg0: i32) -> (i32, i32, i32) {
    %c0_i32 = arith.constant 0 : i32
    %c0_i32_0 = arith.constant 0 : i32
    %c0_i32_1 = arith.constant 0 : i32
    return %arg0, %c0_i32, %c0_i32_0 : i32, i32, i32
  }
  func.func @transform_2(%arg0: i32) -> (i32, i32, i32) {
    %c0_i32 = arith.constant 0 : i32
    %c0_i32_0 = arith.constant 0 : i32
    %c0_i32_1 = arith.constant 0 : i32
    return %arg0, %c0_i32, %c0_i32_0 : i32, i32, i32
  }
  func.func @transform_3(%arg0: i32) -> (i32, i32, i32) {
    %c0_i32 = arith.constant 0 : i32
    %c0_i32_0 = arith.constant 0 : i32
    %c0_i32_1 = arith.constant 0 : i32
    return %arg0, %c0_i32, %c0_i32_0 : i32, i32, i32
  }
}

module attributes {stable_mosaic.version = 11 : i64} {
  func.func @_fc_bank_kernel(%arg0: i32, %arg1: memref<56x2x336xbf16, #tpu.memory_space<vmem>>, %arg2: memref<56x336x64xbf16, #tpu.memory_space<vmem>>, %arg3: memref<56x1x64xf32, #tpu.memory_space<vmem>>, %arg4: memref<56x10x64xf32, #tpu.memory_space<vmem>>, %arg5: memref<56x1x10xf32, #tpu.memory_space<vmem>>, %arg6: memref<56x2x10xf32, #tpu.memory_space<vmem>>, %arg7: memref<56x1x2xf32, #tpu.memory_space<vmem>>, %arg8: memref<56x2x2xf32, #tpu.memory_space<vmem>>) attributes {dimension_semantics = [#tpu.dimension_semantics<parallel>], iteration_bounds = array<i64: 8>, scalar_prefetch = 0 : i64, scratch_operands = 0 : i64, tpu.core_type = #tpu.core_type<tc>, window_params = [{transform_indices = @transform_0, window_bounds = array<i64: 56, 2, 336>}, {transform_indices = @transform_1, window_bounds = array<i64: 56, 336, 64>}, {transform_indices = @transform_2, window_bounds = array<i64: 56, 1, 64>}, {transform_indices = @transform_3, window_bounds = array<i64: 56, 10, 64>}, {transform_indices = @transform_4, window_bounds = array<i64: 56, 1, 10>}, {transform_indices = @transform_5, window_bounds = array<i64: 56, 2, 10>}, {transform_indices = @transform_6, window_bounds = array<i64: 56, 1, 2>}, {transform_indices = @transform_7, window_bounds = array<i64: 56, 2, 2>}]} {
    %c0_i32 = arith.constant 0 : i32
    %c56_i32 = arith.constant 56 : i32
    %0 = arith.addi %c0_i32, %c56_i32 : i32
    %c1_i32 = arith.constant 1 : i32
    scf.for %arg9 = %c0_i32 to %0 step %c1_i32  : i32 {
      %1 = arith.index_cast %arg9 : i32 to index
      %c0 = arith.constant 0 : index
      %c0_1 = arith.constant 0 : index
      %2 = vector.load %arg1[%1, %c0, %c0_1] : memref<56x2x336xbf16, #tpu.memory_space<vmem>>, vector<1x2x336xbf16>
      %3 = vector.shape_cast %2 : vector<1x2x336xbf16> to vector<2x336xbf16>
      %4 = arith.index_cast %arg9 : i32 to index
      %c0_2 = arith.constant 0 : index
      %c0_3 = arith.constant 0 : index
      %5 = vector.load %arg2[%4, %c0_2, %c0_3] : memref<56x336x64xbf16, #tpu.memory_space<vmem>>, vector<1x336x64xbf16>
      %6 = vector.shape_cast %5 : vector<1x336x64xbf16> to vector<336x64xbf16>
      %cst = arith.constant dense<0.000000e+00> : vector<2x64xf32>
      %7 = tpu.matmul %3, %6, %cst {dimension_numbers = #tpu.dot_dimension_numbers<[1], [0], [0], [1], [0, 0, 1, 1], [], []>} : vector<2x336xbf16>, vector<336x64xbf16>, vector<2x64xf32> -> vector<2x64xf32>
      %8 = arith.index_cast %arg9 : i32 to index
      %c0_4 = arith.constant 0 : index
      %c0_5 = arith.constant 0 : index
      %9 = vector.load %arg3[%8, %c0_4, %c0_5] : memref<56x1x64xf32, #tpu.memory_space<vmem>>, vector<1x1x64xf32>
      %10 = vector.shape_cast %9 : vector<1x1x64xf32> to vector<1x64xf32>
      %11 = vector.broadcast %10 : vector<1x64xf32> to vector<2x64xf32>
      %12 = arith.addf %7, %11 : vector<2x64xf32>
      %cst_6 = arith.constant 0.000000e+00 : f32
      %13 = vector.broadcast %cst_6 : f32 to vector<2x64xf32>
      %14 = arith.maximumf %12, %13 : vector<2x64xf32>
      %15 = arith.index_cast %arg9 : i32 to index
      %c0_7 = arith.constant 0 : index
      %c0_8 = arith.constant 0 : index
      %16 = vector.load %arg4[%15, %c0_7, %c0_8] : memref<56x10x64xf32, #tpu.memory_space<vmem>>, vector<1x10x64xf32>
      %17 = vector.shape_cast %16 : vector<1x10x64xf32> to vector<10x64xf32>
      %cst_9 = arith.constant dense<0.000000e+00> : vector<2x10xf32>
      %18 = tpu.matmul %14, %17, %cst_9 {dimension_numbers = #tpu.dot_dimension_numbers<[1], [1], [0], [0], [0, 0, 1, 0], [], []>} : vector<2x64xf32>, vector<10x64xf32>, vector<2x10xf32> -> vector<2x10xf32>
      %19 = arith.index_cast %arg9 : i32 to index
      %c0_10 = arith.constant 0 : index
      %c0_11 = arith.constant 0 : index
      %20 = vector.load %arg5[%19, %c0_10, %c0_11] : memref<56x1x10xf32, #tpu.memory_space<vmem>>, vector<1x1x10xf32>
      %21 = vector.shape_cast %20 : vector<1x1x10xf32> to vector<1x10xf32>
      %22 = vector.broadcast %21 : vector<1x10xf32> to vector<2x10xf32>
      %23 = arith.addf %18, %22 : vector<2x10xf32>
      %cst_12 = arith.constant 0.000000e+00 : f32
      %24 = vector.broadcast %cst_12 : f32 to vector<2x10xf32>
      %25 = arith.maximumf %23, %24 : vector<2x10xf32>
      %26 = arith.index_cast %arg9 : i32 to index
      %c0_13 = arith.constant 0 : index
      %c0_14 = arith.constant 0 : index
      %27 = vector.load %arg6[%26, %c0_13, %c0_14] : memref<56x2x10xf32, #tpu.memory_space<vmem>>, vector<1x2x10xf32>
      %28 = vector.shape_cast %27 : vector<1x2x10xf32> to vector<2x10xf32>
      %cst_15 = arith.constant dense<0.000000e+00> : vector<2x2xf32>
      %29 = tpu.matmul %25, %28, %cst_15 {dimension_numbers = #tpu.dot_dimension_numbers<[1], [1], [0], [0], [0, 0, 1, 0], [], []>} : vector<2x10xf32>, vector<2x10xf32>, vector<2x2xf32> -> vector<2x2xf32>
      %30 = arith.index_cast %arg9 : i32 to index
      %c0_16 = arith.constant 0 : index
      %c0_17 = arith.constant 0 : index
      %31 = vector.load %arg7[%30, %c0_16, %c0_17] : memref<56x1x2xf32, #tpu.memory_space<vmem>>, vector<1x1x2xf32>
      %32 = vector.shape_cast %31 : vector<1x1x2xf32> to vector<1x2xf32>
      %33 = vector.broadcast %32 : vector<1x2xf32> to vector<2x2xf32>
      %34 = arith.addf %29, %33 : vector<2x2xf32>
      %35 = arith.index_cast %arg9 : i32 to index
      %c0_18 = arith.constant 0 : index
      %c0_19 = arith.constant 0 : index
      %36 = vector.load %arg8[%35, %c0_18, %c0_19] : memref<56x2x2xf32, #tpu.memory_space<vmem>>, vector<1x2x2xf32>
      %37 = vector.shape_cast %36 : vector<1x2x2xf32> to vector<2x2xf32>
      %38 = vector.shape_cast %34 : vector<2x2xf32> to vector<1x2x2xf32>
      tpu.vector_store %arg8[%35, %c0_18, %c0_19], %38 {strides = array<i32>} : memref<56x2x2xf32, #tpu.memory_space<vmem>>, vector<1x2x2xf32>,
    }
    %c56_i32_0 = arith.constant 56 : i32
    return
  }
  func.func @transform_0(%arg0: i32) -> (i32, i32, i32) {
    %c0_i32 = arith.constant 0 : i32
    %c0_i32_0 = arith.constant 0 : i32
    %c0_i32_1 = arith.constant 0 : i32
    return %arg0, %c0_i32, %c0_i32_0 : i32, i32, i32
  }
  func.func @transform_1(%arg0: i32) -> (i32, i32, i32) {
    %c0_i32 = arith.constant 0 : i32
    %c0_i32_0 = arith.constant 0 : i32
    %c0_i32_1 = arith.constant 0 : i32
    return %arg0, %c0_i32, %c0_i32_0 : i32, i32, i32
  }
  func.func @transform_2(%arg0: i32) -> (i32, i32, i32) {
    %c0_i32 = arith.constant 0 : i32
    %c0_i32_0 = arith.constant 0 : i32
    %c0_i32_1 = arith.constant 0 : i32
    return %arg0, %c0_i32, %c0_i32_0 : i32, i32, i32
  }
  func.func @transform_3(%arg0: i32) -> (i32, i32, i32) {
    %c0_i32 = arith.constant 0 : i32
    %c0_i32_0 = arith.constant 0 : i32
    %c0_i32_1 = arith.constant 0 : i32
    return %arg0, %c0_i32, %c0_i32_0 : i32, i32, i32
  }
  func.func @transform_4(%arg0: i32) -> (i32, i32, i32) {
    %c0_i32 = arith.constant 0 : i32
    %c0_i32_0 = arith.constant 0 : i32
    %c0_i32_1 = arith.constant 0 : i32
    return %arg0, %c0_i32, %c0_i32_0 : i32, i32, i32
  }
  func.func @transform_5(%arg0: i32) -> (i32, i32, i32) {
    %c0_i32 = arith.constant 0 : i32
    %c0_i32_0 = arith.constant 0 : i32
    %c0_i32_1 = arith.constant 0 : i32
    return %arg0, %c0_i32, %c0_i32_0 : i32, i32, i32
  }
  func.func @transform_6(%arg0: i32) -> (i32, i32, i32) {
    %c0_i32 = arith.constant 0 : i32
    %c0_i32_0 = arith.constant 0 : i32
    %c0_i32_1 = arith.constant 0 : i32
    return %arg0, %c0_i32, %c0_i32_0 : i32, i32, i32
  }
  func.func @transform_7(%arg0: i32) -> (i32, i32, i32) {
    %c0_i32 = arith.constant 0 : i32
    %c0_i32_0 = arith.constant 0 : i32
    %c0_i32_1 = arith.constant 0 : i32
    return %arg0, %c0_i32, %c0_i32_0 : i32, i32, i32
  }
}

module attributes {stable_mosaic.version = 11 : i64} {
  func.func @_head_kernel(%arg0: memref<2x860xf32, #tpu.memory_space<vmem>>, %arg1: memref<860x256xf32, #tpu.memory_space<vmem>>, %arg2: memref<1x256xf32, #tpu.memory_space<vmem>>, %arg3: memref<256x8xf32, #tpu.memory_space<vmem>>, %arg4: memref<1x8xf32, #tpu.memory_space<vmem>>, %arg5: memref<8x2xf32, #tpu.memory_space<vmem>>, %arg6: memref<1x2xf32, #tpu.memory_space<vmem>>, %arg7: memref<2x2xf32, #tpu.memory_space<vmem>>) attributes {dimension_semantics = [], scalar_prefetch = 0 : i64, scratch_operands = 0 : i64, tpu.core_type = #tpu.core_type<tc>} {
    %c0 = arith.constant 0 : index
    %c0_0 = arith.constant 0 : index
    %0 = vector.load %arg0[%c0, %c0_0] : memref<2x860xf32, #tpu.memory_space<vmem>>, vector<2x860xf32>
    %c0_1 = arith.constant 0 : index
    %c0_2 = arith.constant 0 : index
    %1 = vector.load %arg1[%c0_1, %c0_2] : memref<860x256xf32, #tpu.memory_space<vmem>>, vector<860x256xf32>
    %cst = arith.constant dense<0.000000e+00> : vector<2x256xf32>
    %2 = tpu.matmul %0, %1, %cst {dimension_numbers = #tpu.dot_dimension_numbers<[1], [0], [0], [1], [0, 0, 1, 1], [], []>} : vector<2x860xf32>, vector<860x256xf32>, vector<2x256xf32> -> vector<2x256xf32>
    %c0_3 = arith.constant 0 : index
    %c0_4 = arith.constant 0 : index
    %3 = vector.load %arg2[%c0_3, %c0_4] : memref<1x256xf32, #tpu.memory_space<vmem>>, vector<1x256xf32>
    %4 = vector.broadcast %3 : vector<1x256xf32> to vector<2x256xf32>
    %5 = arith.addf %2, %4 : vector<2x256xf32>
    %cst_5 = arith.constant 0.000000e+00 : f32
    %6 = vector.broadcast %cst_5 : f32 to vector<2x256xf32>
    %7 = arith.maximumf %5, %6 : vector<2x256xf32>
    %c0_6 = arith.constant 0 : index
    %c0_7 = arith.constant 0 : index
    %8 = vector.load %arg3[%c0_6, %c0_7] : memref<256x8xf32, #tpu.memory_space<vmem>>, vector<256x8xf32>
    %cst_8 = arith.constant dense<0.000000e+00> : vector<2x8xf32>
    %9 = tpu.matmul %7, %8, %cst_8 {dimension_numbers = #tpu.dot_dimension_numbers<[1], [0], [0], [1], [0, 0, 1, 1], [], []>} : vector<2x256xf32>, vector<256x8xf32>, vector<2x8xf32> -> vector<2x8xf32>
    %c0_9 = arith.constant 0 : index
    %c0_10 = arith.constant 0 : index
    %10 = vector.load %arg4[%c0_9, %c0_10] : memref<1x8xf32, #tpu.memory_space<vmem>>, vector<1x8xf32>
    %11 = vector.broadcast %10 : vector<1x8xf32> to vector<2x8xf32>
    %12 = arith.addf %9, %11 : vector<2x8xf32>
    %cst_11 = arith.constant 0.000000e+00 : f32
    %13 = vector.broadcast %cst_11 : f32 to vector<2x8xf32>
    %14 = arith.maximumf %12, %13 : vector<2x8xf32>
    %c0_12 = arith.constant 0 : index
    %c0_13 = arith.constant 0 : index
    %15 = vector.load %arg5[%c0_12, %c0_13] : memref<8x2xf32, #tpu.memory_space<vmem>>, vector<8x2xf32>
    %cst_14 = arith.constant dense<0.000000e+00> : vector<2x2xf32>
    %16 = tpu.matmul %14, %15, %cst_14 {dimension_numbers = #tpu.dot_dimension_numbers<[1], [0], [0], [1], [0, 0, 1, 1], [], []>} : vector<2x8xf32>, vector<8x2xf32>, vector<2x2xf32> -> vector<2x2xf32>
    %c0_15 = arith.constant 0 : index
    %c0_16 = arith.constant 0 : index
    %17 = vector.load %arg6[%c0_15, %c0_16] : memref<1x2xf32, #tpu.memory_space<vmem>>, vector<1x2xf32>
    %18 = vector.broadcast %17 : vector<1x2xf32> to vector<2x2xf32>
    %19 = arith.addf %16, %18 : vector<2x2xf32>
    %c0_17 = arith.constant 0 : index
    %c0_18 = arith.constant 0 : index
    %20 = vector.load %arg7[%c0_17, %c0_18] : memref<2x2xf32, #tpu.memory_space<vmem>>, vector<2x2xf32>
    tpu.vector_store %arg7[%c0_17, %c0_18], %19 {strides = array<i32>} : memref<2x2xf32, #tpu.memory_space<vmem>>, vector<2x2xf32>,
    return
  }
}

</mosaic_0001>

<bundles_post_ra>
// kernel: phychem_ppi_forward.3
= control target key start
LH: loop header
LB: loop body
LE: loop exit
PB: predicated region body
PF: predicated region fallthrough
CT: control target
= control target key end

     0   :  { %s566_s12 = smov 0   ;;  %s631_s0 = inlined_call_operand.vmem [shape: f32[448,32,48], index: 0, kind: input, shape index: {}]   ;;  %s632_s1 = inlined_call_operand.vmem [shape: f32[448,16,32], index: 1, kind: input, shape index: {}]   ;;  %s633_s2 = inlined_call_operand.vmem [shape: f32[448,16,32], index: 2, kind: input, shape index: {}]   ;;  %s634_s3 = inlined_call_operand.vmem [shape: bf16[448,32,21], index: 3, kind: output, shape index: {}]  }
   0x1 LB: > { %s454_s13 = sadd.s32 4294967295, %s538_s12   ;;  %p458_p0 = scmp.ge.s32.totalorder %s538_s12, 1  ;;  %s538_s12 = sphi %s566_s12, %s13_s12  }
   0x2   : > { %p163_p1 = scmp.lt.s32.totalorder %s538_s12, 9 }
   0x4   : > { %p164_p2 = pnand %p458_p0, %p163_p1 }
   0x5   : > { %s201_s14 = smul.u32 (!%p164_p2), 56, %s454_s13  ;;  %s593_s29 = smov (!%p164_p2), 0  }
   0x6   : > { %167 = sbr.rel (%p164_p2) target bundleno = 784 (0x310), region = 32 }
   0x7   : > { %p202_p3 = scmp.lt.s32.totalorder (!%p164_p2), %s201_s14, 447 }
   0xb   : > { %s636_s14 = smov (!%p202_p3, %s201_s14), 447 }
   0xc   : > { %s477_s15 = sshll.u32 %s636_s14, 5  ;;  %s574_s16 = sshll.u32 %s636_s14, 4 }
   0xd   : > { %s579_s19 = scalar_lea.vmem %s631_s0, %s477_s15  ;;  %s213_s22 = scalar_lea.vmem %s632_s1, %s574_s16 }
   0xe   : > { %s220_s25 = scalar_lea.vmem %s633_s2, %s574_s16  ;;  %s227_s28 = scalar_lea.vmem %s634_s3, %s574_s16 }
   0xf LB: >> { %s467_s30 = sshll.u32 %s542_s29, 5  ;;  %s601_s5 = sshll.u32 %s542_s29, 4  ;;  %vm245_vm0 = vcmask 261120   ;;  %vm354_vm1 = vcmask 166912   ;;  %s542_s29 = sphi %s593_s29, %s234_s29  }
  0x10   : >> { %s236_s4 = scalar_lea.vmem %s579_s19, %s467_s30  ;;  %s242_s8 = scalar_lea.vmem %s213_s22, %s601_s5 }
  0x11   : >> { %v240_v0 = vld [vmem:[%s236_s4 + $0x18] sm:$0xff]  ;;  %v239_v1 = vld [vmem:[%s236_s4 + $0x10] sm:$0xff]  ;;  %v238_v2 = vld [vmem:[%s236_s4 + $0x8] sm:$0xff]  ;;  %s544_s9 = smov 127   ;;  %s295_s13 = scalar_lea.vmem %s220_s25, %s601_s5 }
  0x12   : >> { %482 = vmatpush.msra.mxu2 %v240_v0  ;;  %264 = vmatpush.msra.mxu0 %v240_v0  ;;  %v237_v3 = vld [vmem:[%s236_s4] sm:$0xff]  ;;  %v244_v4 = vld [vmem:[%s242_s8 + $0x8] sm:$0xff]  ;;  %s353_s17 = scalar_lea.vmem %s227_s28, %s601_s5  ;;  %s545_s18 = smov 104  }
  0x13   : >> { %v243_v5 = vld [vmem:[%s242_s8] sm:$0xff]  ;;  %v297_v20 = vld [vmem:[%s295_s13 + $0x8] sm:$0xff]  ;;  %s234_s29 = sadd.s32 1, %s542_s29  }
  0x14   : >> { %483 = vmatpush.msra.mxu2 %v239_v1  ;;  %265 = vmatpush.msra.mxu0 %v239_v1  ;;  %v296_v21 = vld [vmem:[%s295_s13] sm:$0xff]  ;;  %p231_p4 = scmp.ge.s32.totalorder %s234_s29, 56  }
  0x16   : >> { %484 = vmatpush.msra.mxu2 %v238_v2  ;;  %266 = vmatpush.msra.mxu0 %v238_v2 }
  0x18   : >> { %485 = vmatpush.msra.mxu2 %v237_v3  ;;  %267 = vmatpush.msra.mxu0 %v237_v3 }
  0x19   : >> { %470 = vmatmul.msk.f32.vlgmr.msra.gmra.mxu2 %vm245_vm0, %v244_v4  ;;  %469 = vmatmul.msk.f32.vlgmr.msra.gmra.mxu0 %vm245_vm0, %v243_v5 }
  0x96   : >> { %v269_v6 = vpop.f32.mrf.mxu0 }
  0x97   : >> { %v275_v7 = vmax.f32 %v269_v6, 0.0 }
  0x9c   : >> { %v272_v8 = vpop.f32.mrf.mxu2 }
  0x9d   : >> { %v276_v9 = vmax.f32 %v272_v8, 0.0 }
  0x9f   : >> { %v508_v10 = vpack.i.bf16 %v275_v7, %v276_v9 }
  0xa1   : >> { %509 = vrot.lane.b32.xlu0 %v508_v10, %s544_s9 }
 0x113   : >> { %v510_v11 = vpop.permute.xlu0 %509 }
 0x114   : >> { %v512_v12 = vunpack.i.h.bf16 %v510_v11  ;;  %v511_v13 = vunpack.i.l.bf16 %v510_v11 }
 0x116   : >> { %v285_v14 = vmax.f32 %v275_v7, %v512_v12  ;;  %v286_v15 = vmax.f32 %v276_v9, %v511_v13 }
 0x118   : >> { %v513_v16 = vpack.i.bf16 %v285_v14, %v286_v15 }
 0x11a   : >> { %514 = vrot.lane.b32.xlu0 %v513_v16, %s544_s9 }
 0x18c   : >> { %v515_v17 = vpop.permute.xlu0 %514 }
 0x18d   : >> { %v516_v18 = vunpack.i.l.bf16 %v515_v17  ;;  %v517_v19 = vunpack.i.h.bf16 %v515_v17 }
 0x18f   : >> { %316 = vmatpush.msra.mxu1 %v516_v18  ;;  %486 = vmatpush.msra.mxu3 %v516_v18 }
 0x191   : >> { %317 = vmatpush.msra.mxu1 %v517_v19  ;;  %487 = vmatpush.msra.mxu3 %v517_v19 }
 0x193   : >> { %318 = vmatpush.msra.mxu1 %v286_v15  ;;  %488 = vmatpush.msra.mxu3 %v286_v15 }
 0x195   : >> { %319 = vmatpush.msra.mxu1 %v285_v14  ;;  %489 = vmatpush.msra.mxu3 %v285_v14 }
 0x196   : >> { %472 = vmatmul.msk.f32.vlgmr.msra.gmra.mxu3 %vm245_vm0, %v297_v20  ;;  %471 = vmatmul.msk.f32.vlgmr.msra.gmra.mxu1 %vm245_vm0, %v296_v21 }
 0x213   : >> { %v321_v22 = vpop.f32.mrf.mxu1 }
 0x214   : >> { %v327_v23 = vmax.f32 %v321_v22, 0.0 }
 0x219   : >> { %v324_v24 = vpop.f32.mrf.mxu3 }
 0x21a   : >> { %v328_v25 = vmax.f32 %v324_v24, 0.0 }
 0x21c   : >> { %v518_v26 = vpack.i.bf16 %v328_v25, %v327_v23 }
 0x21e   : >> { %519 = vrot.lane.b32.xlu1 %v518_v26, %s544_s9 }
 0x290   : >> { %v520_v27 = vpop.permute.xlu1 %519 }
 0x291   : >> { %v522_v28 = vunpack.i.h.bf16 %v520_v27  ;;  %v521_v29 = vunpack.i.l.bf16 %v520_v27 }
 0x293   : >> { %v338_v30 = vmax.f32 %v328_v25, %v522_v28  ;;  %v337_v31 = vmax.f32 %v327_v23, %v521_v29 }
 0x295   : >> { %v348_v32 = vpack.c.bf16 %v338_v30, %v338_v30  ;;  %v347_v33 = vpack.c.bf16 %v337_v31, %v337_v31  ;;  %v523_v34 = vpack.i.bf16 %v338_v30, %v337_v31 }
 0x297   : >> { %524 = vrot.lane.b32.xlu1 %v523_v34, %s545_s18  ;;  %356 = vst.msk [vmem:[%s353_s17 + $0x4] sm:$0xf] %vm354_vm1, %v348_v32 }
 0x298   : >> { %355 = vst.msk [vmem:[%s353_s17] sm:$0xf] %vm354_vm1, %v347_v33 }
 0x309   : >> { %v525_v35 = vpop.permute.xlu1 %524 }
 0x30a   : >> { %v527_v36 = vunpack.i.h.bf16 %v525_v35  ;;  %v526_v37 = vunpack.i.l.bf16 %v525_v35 }
 0x30b   : > { %233 = sbr.rel (!%p231_p4) target bundleno = 15 (0xf), region = 79 }
 0x30c   : >> { %v350_v38 = vpack.c.bf16 %v527_v36, %v527_v36  ;;  %v349_v39 = vpack.c.bf16 %v526_v37, %v526_v37 }
 0x30e   : >> { %358 = vst.msk [vmem:[%s353_s17 + $0xc] sm:$0xf] %vm354_vm1, %v350_v38 }
 0x30f   : >> { %357 = vst.msk [vmem:[%s353_s17 + $0x8] sm:$0xf] %vm354_vm1, %v349_v39 }
 0x310 PF: > { %s13_s12 = sadd.s32 1, %s538_s12  }
 0x311   : > { %p10_p5 = scmp.ge.s32.totalorder %s13_s12, 10  }
 0x313   :  { %12 = sbr.rel (!%p10_p5) target bundleno = 1 (0x1), region = 90 }

// kernel: phychem_ppi_forward.4
= control target key start
LH: loop header
LB: loop body
LE: loop exit
PB: predicated region body
PF: predicated region fallthrough
CT: control target
= control target key end

     0   :  { %s1067_s24 = smov 0   ;;  %s1184_s0 = inlined_call_operand.vmem [shape: bf16[448,2,336], index: 0, kind: input, shape index: {}]   ;;  %s1185_s1 = inlined_call_operand.vmem [shape: bf16[448,336,64], index: 1, kind: input, shape index: {}]   ;;  %s1186_s2 = inlined_call_operand.vmem [shape: f32[448,1,64], index: 2, kind: input, shape index: {}]   ;;  %s1187_s3 = inlined_call_operand.vmem [shape: f32[448,10,64], index: 3, kind: input, shape index: {}]   ;;  %s1188_s4 = inlined_call_operand.vmem [shape: f32[448,1,10], index: 4, kind: input, shape index: {}]   ;;  %s1189_s5 = inlined_call_operand.vmem [shape: f32[448,2,10], index: 5, kind: input, shape index: {}]   ;;  %s1190_s6 = inlined_call_operand.vmem [shape: f32[448,1,2], index: 6, kind: input, shape index: {}]   ;;  %s1191_s7 = inlined_call_operand.vmem [shape: f32[448,2,2], index: 7, kind: output, shape index: {}]  }
   0x1 LB: > { %s862_s25 = sadd.s32 4294967295, %s1021_s24   ;;  %p866_p0 = scmp.ge.s32.totalorder %s1021_s24, 1  ;;  %s1021_s24 = sphi %s1067_s24, %s17_s24  }
   0x2   : > { %p303_p1 = scmp.lt.s32.totalorder %s1021_s24, 9 }
   0x4   : > { %p304_p2 = pnand %p866_p0, %p303_p1 }
   0x5   : > { %s364_s26 = smul.u32 (!%p304_p2), 56, %s862_s25 }
   0x6   : > { %307 = sbr.rel (%p304_p2) target bundleno = 459 (0x1cb), region = 48 }
   0x7   : > { %p365_p3 = scmp.lt.s32.totalorder (!%p304_p2), %s364_s26, 447 }
   0xb   : > { %s1193_s26 = smov (!%p365_p3, %s364_s26), 447 }
   0xc   : > { %s990_s27 = smul.u32 3, %s1193_s26  ;;  %s380_s30 = scalar_lea.vmem %s1186_s2, %s1193_s26 }
   0xd   : > { %s991_s8 = smul.u32 168, %s1193_s26  ;;  %s967_s9 = sshll.u32 %s1193_s26, 4 }
   0xe   : > { %s1087_s12 = scalar_lea.vmem %s1184_s0, %s990_s27  ;;  %s1092_s15 = scalar_lea.vmem %s1187_s3, %s967_s9 }
   0xf   : > { %s1097_s18 = scalar_lea.vmem %s1185_s1, %s991_s8  ;;  %s392_s21 = scalar_lea.vmem %s1188_s4, %s1193_s26 }
  0x10   : > { %s870_s22 = sshll.u32 %s1193_s26, 1  ;;  %s403_s27 = scalar_lea.vmem %s1190_s6, %s1193_s26 }
  0x11   : > { %s1111_s10 = scalar_lea.vmem %s1189_s5, %s870_s22  ;;  %s1116_s13 = scalar_lea.vmem %s1191_s7, %s870_s22 }
  0x12   : > { %s1118_s8 = smov 0  }
  0x13 LB: >> { %s968_s14 = smul.u32 168, %s1025_s8  ;;  %vm604_vm0 = vcmask 654336   ;;  %s466_s23 = scalar_lea.vmem %s380_s30, %s1025_s8  ;;  %vm656_vm1 = vcmask 523264   ;;  %vm695_vm2 = vcmask 80896   ;;  %vm723_vm3 = vcmask 9216   ;;  %s1025_s8 = sphi %s1118_s8, %s417_s8  }
  0x14   : >> { %s418_s16 = smul.u32 3, %s1025_s8  ;;  %s651_s29 = scalar_lea.vmem %s392_s21, %s1025_s8  ;;  %v1008_v29 = vld [vmem:[%s466_s23] ss:$0 sm:$0xff] }
  0x15   : >> { %s1126_s17 = scalar_lea.vmem %s1097_s18, %s968_s14  ;;  %s958_s9 = sshll.u32 %s1025_s8, 4  ;;  %v1009_v39 = vld [vmem:[%s651_s29] ss:$0 sm:$0xff] }
  0x16   : >> { %v976_v0 = vld [vmem:[%s1126_s17 + $0x38] sm:$0xff]  ;;  %v989_v2 = vld [vmem:[%s1126_s17 + $0xa0] sm:$0xff]  ;;  %v975_v3 = vld [vmem:[%s1126_s17 + $0x30] sm:$0xff]  ;;  %s419_s19 = scalar_lea.vmem %s1087_s12, %s418_s16  ;;  %s648_s11 = scalar_lea.vmem %s1092_s15, %s958_s9 }
  0x17   : >> { %v984_v1 = vld [vmem:[%s1126_s17 + $0x78] sm:$0xff]  ;;  %607 = vmatpush.bf16.msra.mxu0 %v976_v0  ;;  %v983_v4 = vld [vmem:[%s1126_s17 + $0x70] sm:$0xff]  ;;  %636 = vmatpush.bf16.msra.mxu2 %v989_v2  ;;  %v420_v6 = vld [vmem:[%s419_s19] sm:$0x7]  ;;  %s962_s14 = sshll.u32 %s1025_s8, 1  ;;  %s690_s20 = scalar_lea.vmem %s403_s27, %s1025_s8 }
  0x18   : >> { %620 = vmatpush.bf16.msra.mxu1 %v984_v1  ;;  %v988_v5 = vld [vmem:[%s1126_s17 + $0x98] sm:$0xff]  ;;  %v974_v7 = vld [vmem:[%s1126_s17 + $0x28] sm:$0xff]  ;;  %472 = vst [vmem:[#allocation1] ss:$9 sm:$0xff] %v420_v6  ;;  %v987_v9 = vld [vmem:[%s1126_s17 + $0x90] sm:$0xff]  ;;  %s688_s16 = scalar_lea.vmem %s1111_s10, %s962_s14  ;;  %s722_s22 = scalar_lea.vmem %s1116_s13, %s962_s14 }
  0x19   : >> { %v982_v8 = vld [vmem:[%s1126_s17 + $0x68] sm:$0xff]  ;;  %v973_v10 = vld [vmem:[%s1126_s17 + $0x20] sm:$0xff]  ;;  %v972_v13 = vld [vmem:[%s1126_s17 + $0x18] sm:$0xff]  ;;  %s417_s8 = sadd.s32 1, %s1025_s8  }
  0x1a   : >> { %v981_v11 = vld [vmem:[%s1126_s17 + $0x60] sm:$0xff]  ;;  %v986_v12 = vld [vmem:[%s1126_s17 + $0x88] sm:$0xff]  ;;  %v980_v14 = vld [vmem:[%s1126_s17 + $0x58] sm:$0xff]  ;;  %p414_p4 = scmp.ge.s32.totalorder %s417_s8, 56  }
  0x1b   : >> { %608 = vmatpush.bf16.msra.mxu0 %v975_v3  ;;  %637 = vmatpush.bf16.msra.mxu2 %v988_v5  ;;  %v985_v15 = vld [vmem:[%s1126_s17 + $0x80] sm:$0xff]  ;;  %v971_v16 = vld [vmem:[%s1126_s17 + $0x10] sm:$0xff]  ;;  %v970_v19 = vld [vmem:[%s1126_s17 + $0x8] sm:$0xff] }
  0x1c   : >> { %621 = vmatpush.bf16.msra.mxu1 %v983_v4  ;;  %v979_v17 = vld [vmem:[%s1126_s17 + $0x50] sm:$0xff]  ;;  %v978_v20 = vld [vmem:[%s1126_s17 + $0x48] sm:$0xff]  ;;  %v969_v21 = vld [vmem:[%s1126_s17] sm:$0xff] }
  0x1d   : >> { %v977_v22 = vld [vmem:[%s1126_s17 + $0x40] sm:$0xff]  ;;  %v650_v25 = vld [vmem:[%s648_s11 + $0x8] sm:$0x3] }
  0x1e   : >> { %959 = vmatpush.xpose.msk.msra.mxu3 %vm656_vm1, %v650_v25  ;;  %v649_v26 = vld [vmem:[%s648_s11] sm:$0xff] }
  0x1f   : >> { %609 = vmatpush.bf16.msra.mxu0 %v974_v7  ;;  %638 = vmatpush.bf16.msra.mxu2 %v987_v9  ;;  %v475_v18 = vld [vmem:[#allocation1 + $0x12] sm:$0xff]  ;;  %v473_v23 = vld [vmem:[#allocation1] sm:$0xff]  ;;  %v474_v24 = vld [vmem:[#allocation1 + $0x9] sm:$0xff] }
  0x20   : >> { %622 = vmatpush.bf16.msra.mxu1 %v982_v8  ;;  %v689_v27 = vld [vmem:[%s688_s16] sm:$0x3] }
  0x21   : >> { %v1010_v43 = vld [vmem:[%s690_s20] ss:$0 sm:$0xff] }
  0x22   : >> { %960 = vmatpush.xpose.msk.msra.mxu3 %vm656_vm1, %v649_v26 }
  0x23   : >> { %610 = vmatpush.bf16.msra.mxu0 %v973_v10  ;;  %639 = vmatpush.bf16.msra.mxu2 %v986_v12 }
  0x24   : >> { %623 = vmatpush.bf16.msra.mxu1 %v981_v11 }
  0x26   : >> { %963 = vmatpush.xpose.msk.msrb.mxu3 %vm695_vm2, %v689_v27 }
  0x27   : >> { %611 = vmatpush.bf16.msra.mxu0 %v972_v13  ;;  %640 = vmatpush.bf16.msra.mxu2 %v985_v15 }
  0x28   : >> { %624 = vmatpush.bf16.msra.mxu1 %v980_v14 }
  0x2a   : >> { %957 = vmatmul.msk.bf16.vlgmr.msra.gmra.mxu2 %vm604_vm0, %v475_v18 }
  0x2b   : >> { %612 = vmatpush.bf16.msra.mxu0 %v971_v16 }
  0x2c   : >> { %625 = vmatpush.bf16.msra.mxu1 %v979_v17 }
  0x2f   : >> { %613 = vmatpush.bf16.msra.mxu0 %v970_v19 }
  0x30   : >> { %626 = vmatpush.bf16.msra.mxu1 %v978_v20 }
  0x33   : >> { %614 = vmatpush.bf16.msra.mxu0 %v969_v21 }
  0x34   : >> { %627 = vmatpush.bf16.msra.mxu1 %v977_v22 }
  0x36   : >> { %615 = vmatmul.bf16.vlgmr.msra.gmra.mxu0 %v473_v23 }
  0x37   : >> { %628 = vmatmul.bf16.vlgmr.msra.gmra.mxu1 %v474_v24 }
  0xad   : >> { %v642_v28 = vpop.f32.mrf.mxu2 }
  0xb3   : >> { %v616_v30 = vpop.f32.mrf.mxu0 }
  0xb4   : >> { %v629_v31 = vpop.f32.mrf.mxu1  ;;  %v617_v32 = vadd.f32 %v1008_v29, %v616_v30 }
  0xb5   : >> { %v644_v34 = vpop.f32.mrf.mxu2 }
  0xb6   : >> { %v630_v33 = vadd.f32 %v629_v31, %v617_v32 }
  0xb8   : >> { %v643_v35 = vadd.f32 %v642_v28, %v630_v33 }
  0xba   : >> { %v646_v36 = vmax.f32 %v643_v35, 0.0 }
  0xbb   : >> { %v618_v37 = vpop.f32.mrf.mxu0 }
  0xbc   : >> { %v631_v38 = vpop.f32.mrf.mxu1  ;;  %961 = vmatmul.msk.f32.vlgmr.msra.gmra.mxu3 %vm656_vm1, %v646_v36 }
 0x13f   : >> { %v683_v40 = vpop.f32.mrf.mxu3 }
 0x140   : >> { %v684_v41 = vadd.f32 %v1009_v39, %v683_v40 }
 0x142   : >> { %v686_v42 = vmax.f32 %v684_v41, 0.0 }
 0x144   : >> { %964 = vmatmul.msk.f32.vlgmr.msrb.gmra.mxu3 %vm695_vm2, %v686_v42 }
 0x1c6   : > { %416 = sbr.rel (!%p414_p4) target bundleno = 19 (0x13), region = 111 }
 0x1c7   : >> { %v719_v44 = vpop.f32.mrf.mxu3 }
 0x1c8   : >> { %v720_v45 = vadd.f32 %v1010_v43, %v719_v44 }
 0x1ca   : >> { %724 = vst.msk [vmem:[%s722_s22] sm:$0x3] %vm723_vm3, %v720_v45 }
 0x1cb PF: > { %s17_s24 = sadd.s32 1, %s1021_s24  }
 0x1cc   : > { %p14_p5 = scmp.ge.s32.totalorder %s17_s24, 10  }
 0x1ce   :  { %16 = sbr.rel (!%p14_p5) target bundleno = 1 (0x1), region = 122 }

// kernel: phychem_ppi_forward.5
= control target key start
LH: loop header
LB: loop body
LE: loop exit
PB: predicated region body
PF: predicated region fallthrough
CT: control target
= control target key end

     0   :  { %vm272_vm0 = vcmask 1043456   ;;  %s1557_s0 = inlined_call_operand.vmem [shape: f32[2,860], index: 0, kind: input, shape index: {}]   ;;  %s1558_s1 = inlined_call_operand.vmem [shape: f32[860,256], index: 1, kind: input, shape index: {}]   ;;  %s1559_s2 = inlined_call_operand.vmem [shape: f32[1,256], index: 2, kind: input, shape index: {}]   ;;  %s1560_s3 = inlined_call_operand.vmem [shape: f32[256,8], index: 3, kind: input, shape index: {}]   ;;  %s1561_s4 = inlined_call_operand.vmem [shape: f32[1,8], index: 4, kind: input, shape index: {}]   ;;  %s1562_s5 = inlined_call_operand.vmem [shape: f32[8,2], index: 5, kind: input, shape index: {}]   ;;  %s1563_s6 = inlined_call_operand.vmem [shape: f32[1,2], index: 6, kind: input, shape index: {}]   ;;  %s1564_s7 = inlined_call_operand.hbm [shape: f32[2,2], index: 7, kind: output, shape index: {}]  }
   0x1   :  { %v123_v0 = vld [vmem:[%s1558_s1 + $0x2f0] sm:$0xff]  ;;  %v121_v2 = vld [vmem:[%s1558_s1 + $0x2e0] sm:$0xff] }
   0x2   :  { %v59_v1 = vld [vmem:[%s1558_s1 + $0xf0] sm:$0xff]  ;;  %319 = vmatpush.msra.mxu2 %v123_v0  ;;  %v57_v3 = vld [vmem:[%s1558_s1 + $0xe0] sm:$0xff] }
   0x3   :  { %279 = vmatpush.msra.mxu0 %v59_v1  ;;  %v91_v4 = vld [vmem:[%s1558_s1 + $0x1f0] sm:$0xff]  ;;  %v89_v7 = vld [vmem:[%s1558_s1 + $0x1e0] sm:$0xff] }
   0x4   :  { %299 = vmatpush.msra.mxu1 %v91_v4  ;;  %v119_v5 = vld [vmem:[%s1558_s1 + $0x2d0] sm:$0xff]  ;;  %320 = vmatpush.msra.mxu2 %v121_v2  ;;  %v117_v9 = vld [vmem:[%s1558_s1 + $0x2c0] sm:$0xff] }
   0x5   :  { %v55_v6 = vld [vmem:[%s1558_s1 + $0xd0] sm:$0xff]  ;;  %280 = vmatpush.msra.mxu0 %v57_v3  ;;  %v53_v10 = vld [vmem:[%s1558_s1 + $0xc0] sm:$0xff] }
   0x6   :  { %v87_v8 = vld [vmem:[%s1558_s1 + $0x1d0] sm:$0xff]  ;;  %300 = vmatpush.msra.mxu1 %v89_v7  ;;  %321 = vmatpush.msra.mxu2 %v119_v5  ;;  %v85_v11 = vld [vmem:[%s1558_s1 + $0x1c0] sm:$0xff] }
   0x7   :  { %281 = vmatpush.msra.mxu0 %v55_v6  ;;  %v115_v12 = vld [vmem:[%s1558_s1 + $0x2b0] sm:$0xff]  ;;  %v113_v15 = vld [vmem:[%s1558_s1 + $0x2a0] sm:$0xff] }
   0x8   :  { %301 = vmatpush.msra.mxu1 %v87_v8  ;;  %v51_v13 = vld [vmem:[%s1558_s1 + $0xb0] sm:$0xff]  ;;  %322 = vmatpush.msra.mxu2 %v117_v9  ;;  %v49_v16 = vld [vmem:[%s1558_s1 + $0xa0] sm:$0xff] }
   0x9   :  { %282 = vmatpush.msra.mxu0 %v53_v10  ;;  %v83_v14 = vld [vmem:[%s1558_s1 + $0x1b0] sm:$0xff]  ;;  %v81_v17 = vld [vmem:[%s1558_s1 + $0x1a0] sm:$0xff] }
   0xa   :  { %302 = vmatpush.msra.mxu1 %v85_v11  ;;  %323 = vmatpush.msra.mxu2 %v115_v12  ;;  %v111_v18 = vld [vmem:[%s1558_s1 + $0x290] sm:$0xff]  ;;  %v153_v22 = vld [vmem:[%s1558_s1 + $0x3e0] sm:$0xff] }
   0xb   :  { %283 = vmatpush.msra.mxu0 %v51_v13  ;;  %v47_v19 = vld [vmem:[%s1558_s1 + $0x90] sm:$0xff]  ;;  %v109_v23 = vld [vmem:[%s1558_s1 + $0x280] sm:$0xff] }
   0xc   :  { %303 = vmatpush.msra.mxu1 %v83_v14  ;;  %v155_v20 = vld [vmem:[%s1558_s1 + $0x3f0] sm:$0xff]  ;;  %324 = vmatpush.msra.mxu2 %v113_v15  ;;  %v45_v24 = vld [vmem:[%s1558_s1 + $0x80] sm:$0xff]  ;;  %v28_v14 = vld [vmem:[%s1557_s0 + $0x8] sm:$0x3f] }
   0xd   :  { %284 = vmatpush.msra.mxu0 %v49_v16  ;;  %v79_v21 = vld [vmem:[%s1558_s1 + $0x190] sm:$0xff]  ;;  %339 = vmatpush.msra.mxu3 %v155_v20  ;;  %v77_v25 = vld [vmem:[%s1558_s1 + $0x180] sm:$0xff]  ;;  %255 = vst [vmem:[#allocation1 + $0x20] ss:$4 sm:$0xff] %v28_v14 }
   0xe   :  { %304 = vmatpush.msra.mxu1 %v81_v17  ;;  %325 = vmatpush.msra.mxu2 %v111_v18  ;;  %v151_v26 = vld [vmem:[%s1558_s1 + $0x3d0] sm:$0xff]  ;;  %v149_v30 = vld [vmem:[%s1558_s1 + $0x3c0] sm:$0xff] }
   0xf   :  { %285 = vmatpush.msra.mxu0 %v47_v19  ;;  %v107_v27 = vld [vmem:[%s1558_s1 + $0x270] sm:$0xff]  ;;  %340 = vmatpush.msra.mxu3 %v153_v22  ;;  %v105_v31 = vld [vmem:[%s1558_s1 + $0x260] sm:$0xff]  ;;  %v60_v22 = vld [vmem:[%s1558_s1 + $0xf8] sm:$0xff] }
  0x10   :  { %305 = vmatpush.msra.mxu1 %v79_v21  ;;  %v43_v28 = vld [vmem:[%s1558_s1 + $0x70] sm:$0xff]  ;;  %326 = vmatpush.msra.mxu2 %v109_v23  ;;  %v41_v32 = vld [vmem:[%s1558_s1 + $0x60] sm:$0xff] }
  0x11   :  { %286 = vmatpush.msra.mxu0 %v45_v24  ;;  %v75_v29 = vld [vmem:[%s1558_s1 + $0x170] sm:$0xff]  ;;  %341 = vmatpush.msra.mxu3 %v151_v26  ;;  %v73_v33 = vld [vmem:[%s1558_s1 + $0x160] sm:$0xff] }
  0x12   :  { %306 = vmatpush.msra.mxu1 %v77_v25  ;;  %327 = vmatpush.msra.mxu2 %v107_v27  ;;  %v147_v34 = vld [vmem:[%s1558_s1 + $0x3b0] sm:$0xff]  ;;  %v145_v38 = vld [vmem:[%s1558_s1 + $0x3a0] sm:$0xff] }
  0x13   :  { %287 = vmatpush.msra.mxu0 %v43_v28  ;;  %v103_v35 = vld [vmem:[%s1558_s1 + $0x250] sm:$0xff]  ;;  %342 = vmatpush.msra.mxu3 %v149_v30  ;;  %v101_v39 = vld [vmem:[%s1558_s1 + $0x240] sm:$0xff]  ;;  %v58_v30 = vld [vmem:[%s1558_s1 + $0xe8] sm:$0xff] }
  0x14   :  { %307 = vmatpush.msra.mxu1 %v75_v29  ;;  %v39_v36 = vld [vmem:[%s1558_s1 + $0x50] sm:$0xff]  ;;  %328 = vmatpush.msra.mxu2 %v105_v31  ;;  %v37_v40 = vld [vmem:[%s1558_s1 + $0x40] sm:$0xff] }
  0x15   :  { %288 = vmatpush.msra.mxu0 %v41_v32  ;;  %v71_v37 = vld [vmem:[%s1558_s1 + $0x150] sm:$0xff]  ;;  %343 = vmatpush.msra.mxu3 %v147_v34  ;;  %v69_v41 = vld [vmem:[%s1558_s1 + $0x140] sm:$0xff] }
  0x16   :  { %308 = vmatpush.msra.mxu1 %v73_v33  ;;  %329 = vmatpush.msra.mxu2 %v103_v35  ;;  %v143_v42 = vld [vmem:[%s1558_s1 + $0x390] sm:$0xff]  ;;  %v141_v46 = vld [vmem:[%s1558_s1 + $0x380] sm:$0xff] }
  0x17   :  { %289 = vmatpush.msra.mxu0 %v39_v36  ;;  %v99_v43 = vld [vmem:[%s1558_s1 + $0x230] sm:$0xff]  ;;  %344 = vmatpush.msra.mxu3 %v145_v38  ;;  %v97_v47 = vld [vmem:[%s1558_s1 + $0x220] sm:$0xff] }
  0x18   :  { %309 = vmatpush.msra.mxu1 %v71_v37  ;;  %v35_v44 = vld [vmem:[%s1558_s1 + $0x30] sm:$0xff]  ;;  %330 = vmatpush.msra.mxu2 %v101_v39  ;;  %v33_v48 = vld [vmem:[%s1558_s1 + $0x20] sm:$0xff] }
  0x19   :  { %290 = vmatpush.msra.mxu0 %v37_v40  ;;  %v67_v45 = vld [vmem:[%s1558_s1 + $0x130] sm:$0xff]  ;;  %345 = vmatpush.msra.mxu3 %v143_v42  ;;  %v65_v49 = vld [vmem:[%s1558_s1 + $0x120] sm:$0xff] }
  0x1a   :  { %310 = vmatpush.msra.mxu1 %v69_v41  ;;  %331 = vmatpush.msra.mxu2 %v99_v43  ;;  %v139_v50 = vld [vmem:[%s1558_s1 + $0x370] sm:$0xff]  ;;  %v137_v54 = vld [vmem:[%s1558_s1 + $0x360] sm:$0xff]  ;;  %v92_v41 = vld [vmem:[%s1558_s1 + $0x1f8] sm:$0xff] }
  0x1b   :  { %291 = vmatpush.msra.mxu0 %v35_v44  ;;  %v95_v51 = vld [vmem:[%s1558_s1 + $0x210] sm:$0xff]  ;;  %346 = vmatpush.msra.mxu3 %v141_v46  ;;  %v93_v55 = vld [vmem:[%s1558_s1 + $0x200] sm:$0xff]  ;;  %v56_v43 = vld [vmem:[%s1558_s1 + $0xd8] sm:$0xff] }
  0x1c   :  { %311 = vmatpush.msra.mxu1 %v67_v45  ;;  %v31_v52 = vld [vmem:[%s1558_s1 + $0x10] sm:$0xff]  ;;  %332 = vmatpush.msra.mxu2 %v97_v47  ;;  %v29_v56 = vld [vmem:[%s1558_s1] sm:$0xff]  ;;  %v90_v45 = vld [vmem:[%s1558_s1 + $0x1e8] sm:$0xff] }
  0x1d   :  { %292 = vmatpush.msra.mxu0 %v33_v48  ;;  %v63_v53 = vld [vmem:[%s1558_s1 + $0x110] sm:$0xff]  ;;  %347 = vmatpush.msra.mxu3 %v139_v50  ;;  %v61_v59 = vld [vmem:[%s1558_s1 + $0x100] sm:$0xff]  ;;  %v54_v48 = vld [vmem:[%s1558_s1 + $0xc8] sm:$0xff] }
  0x1e   :  { %312 = vmatpush.msra.mxu1 %v65_v49  ;;  %333 = vmatpush.msra.mxu2 %v95_v51  ;;  %v243_v57 = vld [vmem:[%s1558_s1 + $0x6b0] sm:$0xf]  ;;  %v241_v61 = vld [vmem:[%s1558_s1 + $0x6a0] sm:$0xff]  ;;  %v88_v49 = vld [vmem:[%s1558_s1 + $0x1d8] sm:$0xff] }
  0x1f   :  { %293 = vmatpush.msra.mxu0 %v31_v52  ;;  %v187_v58 = vld [vmem:[%s1558_s1 + $0x4f0] sm:$0xff]  ;;  %348 = vmatpush.msra.mxu3 %v137_v54  ;;  %v185_v62 = vld [vmem:[%s1558_s1 + $0x4e0] sm:$0xff] }
  0x20   :  { %313 = vmatpush.msra.mxu1 %v63_v53  ;;  %v135_v60 = vld [vmem:[%s1558_s1 + $0x350] sm:$0xff]  ;;  %334 = vmatpush.msra.mxu2 %v93_v55  ;;  %v133_v0 = vld [vmem:[%s1558_s1 + $0x340] sm:$0xff] }
  0x21   :  { %294 = vmatpush.msra.mxu0 %v29_v56  ;;  %v219_v63 = vld [vmem:[%s1558_s1 + $0x5f0] sm:$0xff]  ;;  %v27_v1 = vld [vmem:[%s1557_s0] sm:$0xff]  ;;  %349 = vmatpush.msra.mxu3 %v135_v60 }
  0x22   :  { %685 = vmatpush.msk.msrb.mxu2 %vm272_vm0, %v243_v57  ;;  %314 = vmatpush.msra.mxu1 %v61_v59  ;;  %v239_v2 = vld [vmem:[%s1558_s1 + $0x690] sm:$0xff]  ;;  %253 = vst [vmem:[#allocation1] ss:$4 sm:$0xff] %v27_v1  ;;  %v217_v4 = vld [vmem:[%s1558_s1 + $0x5e0] sm:$0xff] }
  0x23   :  { %359 = vmatpush.msrb.mxu0 %v187_v58  ;;  %v183_v3 = vld [vmem:[%s1558_s1 + $0x4d0] sm:$0xff]  ;;  %v237_v6 = vld [vmem:[%s1558_s1 + $0x680] sm:$0xff]  ;;  %350 = vmatpush.msra.mxu3 %v133_v0 }
  0x24   :  { %404 = vmatpush.msrb.mxu2 %v241_v61  ;;  %v131_v5 = vld [vmem:[%s1558_s1 + $0x330] sm:$0xff]  ;;  %379 = vmatpush.msrb.mxu1 %v219_v63  ;;  %v181_v7 = vld [vmem:[%s1558_s1 + $0x4c0] sm:$0xff] }
  0x25   :  { %360 = vmatpush.msrb.mxu0 %v185_v62  ;;  %v215_v8 = vld [vmem:[%s1558_s1 + $0x5d0] sm:$0xff]  ;;  %v129_v9 = vld [vmem:[%s1558_s1 + $0x320] sm:$0xff]  ;;  %351 = vmatpush.msra.mxu3 %v131_v5 }
  0x26   :  { %405 = vmatpush.msrb.mxu2 %v239_v2  ;;  %380 = vmatpush.msrb.mxu1 %v217_v4  ;;  %v235_v10 = vld [vmem:[%s1558_s1 + $0x670] sm:$0xff]  ;;  %v213_v12 = vld [vmem:[%s1558_s1 + $0x5c0] sm:$0xff] }
  0x27   :  { %361 = vmatpush.msrb.mxu0 %v183_v3  ;;  %v179_v11 = vld [vmem:[%s1558_s1 + $0x4b0] sm:$0xff]  ;;  %v233_v15 = vld [vmem:[%s1558_s1 + $0x660] sm:$0xff]  ;;  %352 = vmatpush.msra.mxu3 %v129_v9 }
  0x28   :  { %406 = vmatpush.msrb.mxu2 %v237_v6  ;;  %v127_v13 = vld [vmem:[%s1558_s1 + $0x310] sm:$0xff]  ;;  %381 = vmatpush.msrb.mxu1 %v215_v8  ;;  %v177_v16 = vld [vmem:[%s1558_s1 + $0x4a0] sm:$0xff] }
  0x29   :  { %362 = vmatpush.msrb.mxu0 %v181_v7  ;;  %v211_v17 = vld [vmem:[%s1558_s1 + $0x5b0] sm:$0xff]  ;;  %v125_v18 = vld [vmem:[%s1558_s1 + $0x300] sm:$0xff]  ;;  %353 = vmatpush.msra.mxu3 %v127_v13  ;;  %v1066_v38 = vld.sshfl [vmem:[#allocation1 + $0x18] sm:$0xff pattern:$0x73625140] }
  0x2a   :  { %407 = vmatpush.msrb.mxu2 %v235_v10  ;;  %382 = vmatpush.msrb.mxu1 %v213_v12  ;;  %v231_v19 = vld [vmem:[%s1558_s1 + $0x650] sm:$0xff]  ;;  %v209_v21 = vld [vmem:[%s1558_s1 + $0x5a0] sm:$0xff]  ;;  %v1094_v47 = vld.sshfl [vmem:[#allocation1 + $0x8] sm:$0xff pattern:$0x73625140] }
  0x2b   :  { %363 = vmatpush.msrb.mxu0 %v179_v11  ;;  %v175_v20 = vld [vmem:[%s1558_s1 + $0x490] sm:$0xff]  ;;  %v229_v23 = vld [vmem:[%s1558_s1 + $0x640] sm:$0xff]  ;;  %354 = vmatpush.msra.mxu3 %v125_v18 }
  0x2c   :  { %408 = vmatpush.msrb.mxu2 %v233_v15  ;;  %383 = vmatpush.msrb.mxu1 %v211_v17  ;;  %v173_v24 = vld [vmem:[%s1558_s1 + $0x480] sm:$0xff]  ;;  %v207_v25 = vld [vmem:[%s1558_s1 + $0x590] sm:$0xff] }
  0x2d   :  { %364 = vmatpush.msrb.mxu0 %v177_v16  ;;  %v1031_v26 = vld.sshfl [vmem:[#allocation1 + $0x10] sm:$0xff pattern:$0x73625140]  ;;  %419 = vmatpush.msrb.mxu3 %v60_v22  ;;  %v205_v29 = vld [vmem:[%s1558_s1 + $0x580] sm:$0xff] }
  0x2e   :  { %409 = vmatpush.msrb.mxu2 %v231_v19  ;;  %384 = vmatpush.msrb.mxu1 %v209_v21  ;;  %v227_v27 = vld [vmem:[%s1558_s1 + $0x630] sm:$0xff]  ;;  %v225_v31 = vld [vmem:[%s1558_s1 + $0x620] sm:$0xff] }
  0x2f   :  { %365 = vmatpush.msrb.mxu0 %v175_v20  ;;  %v171_v28 = vld [vmem:[%s1558_s1 + $0x470] sm:$0xff]  ;;  %v169_v32 = vld [vmem:[%s1558_s1 + $0x460] sm:$0xff]  ;;  %335 = vmatmul.f32.vlgmr.msra.gmra.mxu2 %v1031_v26 }
  0x30   :  { %410 = vmatpush.msrb.mxu2 %v229_v23  ;;  %385 = vmatpush.msrb.mxu1 %v207_v25  ;;  %v203_v33 = vld [vmem:[%s1558_s1 + $0x570] sm:$0xff]  ;;  %v1055_v34 = vld.sshfl [vmem:[#allocation1] sm:$0xff pattern:$0x73625140] }
  0x31   :  { %366 = vmatpush.msrb.mxu0 %v173_v24  ;;  %v223_v35 = vld [vmem:[%s1558_s1 + $0x610] sm:$0xff]  ;;  %420 = vmatpush.msrb.mxu3 %v58_v30  ;;  %v201_v37 = vld [vmem:[%s1558_s1 + $0x560] sm:$0xff] }
  0x32   :  { %411 = vmatpush.msrb.mxu2 %v227_v27  ;;  %386 = vmatpush.msrb.mxu1 %v205_v29  ;;  %v167_v36 = vld [vmem:[%s1558_s1 + $0x450] sm:$0xff]  ;;  %v221_v39 = vld [vmem:[%s1558_s1 + $0x600] sm:$0xff] }
  0x33   :  { %367 = vmatpush.msrb.mxu0 %v171_v28  ;;  %v165_v40 = vld [vmem:[%s1558_s1 + $0x440] sm:$0xff]  ;;  %v199_v42 = vld [vmem:[%s1558_s1 + $0x550] sm:$0xff]  ;;  %355 = vmatmul.f32.vlgmr.msra.gmra.mxu3 %v1066_v38 }
  0x34   :  { %412 = vmatpush.msrb.mxu2 %v225_v31  ;;  %387 = vmatpush.msrb.mxu1 %v203_v33  ;;  %v163_v44 = vld [vmem:[%s1558_s1 + $0x430] sm:$0xff]  ;;  %v197_v46 = vld [vmem:[%s1558_s1 + $0x540] sm:$0xff] }
  0x35   :  { %368 = vmatpush.msrb.mxu0 %v169_v32  ;;  %421 = vmatpush.msrb.mxu3 %v56_v43  ;;  %v161_v50 = vld [vmem:[%s1558_s1 + $0x420] sm:$0xff] }
  0x36   :  { %295 = vmatmul.f32.vlgmr.msra.gmra.mxu0 %v1055_v34  ;;  %413 = vmatpush.msrb.mxu2 %v223_v35 }
  0x37   :  { %369 = vmatpush.msrb.mxu0 %v167_v36  ;;  %388 = vmatpush.msrb.mxu1 %v201_v37 }
  0x38   :  { %414 = vmatpush.msrb.mxu2 %v221_v39 }
  0x39   :  { %370 = vmatpush.msrb.mxu0 %v165_v40  ;;  %389 = vmatpush.msrb.mxu1 %v199_v42 }
  0x3a   :  { %439 = vmatpush.msra.mxu2 %v92_v41 }
  0x3b   :  { %371 = vmatpush.msrb.mxu0 %v163_v44 }
  0x3c   :  { %12 = vsyncpa [#allocation3], 0  ;;  %440 = vmatpush.msra.mxu2 %v90_v45  ;;  %390 = vmatpush.msrb.mxu1 %v197_v46  ;;  %v195_v51 = vld [vmem:[%s1558_s1 + $0x530] sm:$0xff]  ;;  %v52_v52 = vld [vmem:[%s1558_s1 + $0xb8] sm:$0xff]  ;;  %vm269_vm1 = vcmask 752640   ;;  %vm643_vm2 = vcmask 64512  }
  0x3d   :  { %315 = vmatmul.f32.vlgmr.msra.gmra.mxu1 %v1094_v47  ;;  %422 = vmatpush.msrb.mxu3 %v54_v48  ;;  %v86_v53 = vld [vmem:[%s1558_s1 + $0x1c8] sm:$0xff]  ;;  %v159_v54 = vld [vmem:[%s1558_s1 + $0x410] sm:$0xff]  ;;  %v193_v55 = vld [vmem:[%s1558_s1 + $0x520] sm:$0xff]  ;;  %s719_s29 = smov [#allocation2]   ;;  %vm667_vm3 = vcmask 9216  }
  0x3e   :  { %441 = vmatpush.msra.mxu2 %v88_v49  ;;  %372 = vmatpush.msrb.mxu0 %v161_v50  ;;  %v1121_v56 = vld.sshfl [vmem:[#allocation1 + $0x30] sm:$0xff pattern:$0x73625140]  ;;  %v50_v57 = vld [vmem:[%s1558_s1 + $0xa8] sm:$0xff]  ;;  %v84_v58 = vld [vmem:[%s1558_s1 + $0x1b8] sm:$0xff]  ;;  %s674_s30 = sshll.u32 %s719_s29, 4  ;;  %s675_s30 = int_to_ptr.vmem [resolvable:$true] %s674_s30 }
  0x3f   :  { %391 = vmatpush.msrb.mxu1 %v195_v51  ;;  %423 = vmatpush.msrb.mxu3 %v52_v52  ;;  %v157_v59 = vld [vmem:[%s1558_s1 + $0x400] sm:$0xff]  ;;  %v191_v60 = vld [vmem:[%s1558_s1 + $0x510] sm:$0xff]  ;;  %v48_v62 = vld [vmem:[%s1558_s1 + $0x98] sm:$0xff] }
  0x40   :  { %442 = vmatpush.msra.mxu2 %v86_v53  ;;  %373 = vmatpush.msrb.mxu0 %v159_v54  ;;  %v1137_v61 = vld.sshfl [vmem:[#allocation1 + $0x20] sm:$0xff pattern:$0x73625140]  ;;  %v82_v63 = vld [vmem:[%s1558_s1 + $0x1a8] sm:$0xff]  ;;  %v80_v3 = vld [vmem:[%s1558_s1 + $0x198] sm:$0xff] }
  0x41   :  { %392 = vmatpush.msrb.mxu1 %v193_v55  ;;  %686 = vmatmul.msk.f32.vlgmr.msrb.gmra.mxu2 %vm269_vm1, %v1121_v56  ;;  %v189_v0 = vld [vmem:[%s1558_s1 + $0x500] sm:$0xff]  ;;  %v1148_v1 = vld.sshfl [vmem:[#allocation1 + $0x28] sm:$0xff pattern:$0x73625140]  ;;  %v124_v4 = vld [vmem:[%s1558_s1 + $0x2f8] sm:$0xff] }
  0x42   :  { %424 = vmatpush.msrb.mxu3 %v50_v57  ;;  %443 = vmatpush.msra.mxu2 %v84_v58  ;;  %v46_v2 = vld [vmem:[%s1558_s1 + $0x88] sm:$0xff]  ;;  %v44_v5 = vld [vmem:[%s1558_s1 + $0x78] sm:$0xff] }
  0x43   :  { %374 = vmatpush.msrb.mxu0 %v157_v59  ;;  %393 = vmatpush.msrb.mxu1 %v191_v60  ;;  %v156_v6 = vld [vmem:[%s1558_s1 + $0x3f8] sm:$0xff]  ;;  %v78_v7 = vld [vmem:[%s1558_s1 + $0x188] sm:$0xff] }
  0x44   :  { %375 = vmatmul.f32.vlgmr.msrb.gmra.mxu0 %v1137_v61  ;;  %425 = vmatpush.msrb.mxu3 %v48_v62  ;;  %v122_v8 = vld [vmem:[%s1558_s1 + $0x2e8] sm:$0xff]  ;;  %v76_v11 = vld [vmem:[%s1558_s1 + $0x178] sm:$0xff] }
  0x45   :  { %444 = vmatpush.msra.mxu2 %v82_v63  ;;  %394 = vmatpush.msrb.mxu1 %v189_v0  ;;  %v42_v9 = vld [vmem:[%s1558_s1 + $0x68] sm:$0xff]  ;;  %v120_v12 = vld [vmem:[%s1558_s1 + $0x2d8] sm:$0xff] }
  0x46   :  { %395 = vmatmul.f32.vlgmr.msrb.gmra.mxu1 %v1148_v1  ;;  %426 = vmatpush.msrb.mxu3 %v46_v2  ;;  %v154_v10 = vld [vmem:[%s1558_s1 + $0x3e8] sm:$0xff]  ;;  %v40_v13 = vld [vmem:[%s1558_s1 + $0x58] sm:$0xff] }
  0x47   :  { %445 = vmatpush.msra.mxu2 %v80_v3  ;;  %459 = vmatpush.msra.mxu0 %v124_v4  ;;  %v152_v14 = vld [vmem:[%s1558_s1 + $0x3d8] sm:$0xff]  ;;  %v74_v15 = vld [vmem:[%s1558_s1 + $0x168] sm:$0xff] }
  0x48   :  { %427 = vmatpush.msrb.mxu3 %v44_v5  ;;  %479 = vmatpush.msra.mxu1 %v156_v6  ;;  %v118_v16 = vld [vmem:[%s1558_s1 + $0x2c8] sm:$0xff]  ;;  %v72_v19 = vld [vmem:[%s1558_s1 + $0x158] sm:$0xff] }
  0x49   :  { %446 = vmatpush.msra.mxu2 %v78_v7  ;;  %460 = vmatpush.msra.mxu0 %v122_v8  ;;  %v38_v17 = vld [vmem:[%s1558_s1 + $0x48] sm:$0xff]  ;;  %v116_v20 = vld [vmem:[%s1558_s1 + $0x2b8] sm:$0xff] }
  0x4a   :  { %428 = vmatpush.msrb.mxu3 %v42_v9  ;;  %480 = vmatpush.msra.mxu1 %v154_v10  ;;  %v150_v18 = vld [vmem:[%s1558_s1 + $0x3c8] sm:$0xff]  ;;  %v36_v21 = vld [vmem:[%s1558_s1 + $0x38] sm:$0xff] }
  0x4b   :  { %447 = vmatpush.msra.mxu2 %v76_v11  ;;  %461 = vmatpush.msra.mxu0 %v120_v12  ;;  %v148_v22 = vld [vmem:[%s1558_s1 + $0x3b8] sm:$0xff]  ;;  %v70_v23 = vld [vmem:[%s1558_s1 + $0x148] sm:$0xff] }
  0x4c   :  { %429 = vmatpush.msrb.mxu3 %v40_v13  ;;  %481 = vmatpush.msra.mxu1 %v152_v14  ;;  %v114_v24 = vld [vmem:[%s1558_s1 + $0x2a8] sm:$0xff]  ;;  %v68_v28 = vld [vmem:[%s1558_s1 + $0x138] sm:$0xff] }
  0x4d   :  { %448 = vmatpush.msra.mxu2 %v74_v15  ;;  %462 = vmatpush.msra.mxu0 %v118_v16  ;;  %v34_v25 = vld [vmem:[%s1558_s1 + $0x28] sm:$0xff]  ;;  %v112_v29 = vld [vmem:[%s1558_s1 + $0x298] sm:$0xff] }
  0x4e   :  { %430 = vmatpush.msrb.mxu3 %v38_v17  ;;  %482 = vmatpush.msra.mxu1 %v150_v18  ;;  %v146_v27 = vld [vmem:[%s1558_s1 + $0x3a8] sm:$0xff]  ;;  %v32_v30 = vld [vmem:[%s1558_s1 + $0x18] sm:$0xff] }
  0x4f   :  { %449 = vmatpush.msra.mxu2 %v72_v19  ;;  %463 = vmatpush.msra.mxu0 %v116_v20  ;;  %v144_v31 = vld [vmem:[%s1558_s1 + $0x398] sm:$0xff]  ;;  %v66_v32 = vld [vmem:[%s1558_s1 + $0x128] sm:$0xff] }
  0x50   :  { %431 = vmatpush.msrb.mxu3 %v36_v21  ;;  %483 = vmatpush.msra.mxu1 %v148_v22  ;;  %v110_v33 = vld [vmem:[%s1558_s1 + $0x288] sm:$0xff]  ;;  %v64_v37 = vld [vmem:[%s1558_s1 + $0x118] sm:$0xff] }
  0x51   :  { %450 = vmatpush.msra.mxu2 %v70_v23  ;;  %464 = vmatpush.msra.mxu0 %v114_v24  ;;  %v30_v35 = vld [vmem:[%s1558_s1 + $0x8] sm:$0xff]  ;;  %v188_v39 = vld [vmem:[%s1558_s1 + $0x4f8] sm:$0xff] }
  0x52   :  { %432 = vmatpush.msrb.mxu3 %v34_v25  ;;  %484 = vmatpush.msra.mxu1 %v146_v27  ;;  %v142_v36 = vld [vmem:[%s1558_s1 + $0x388] sm:$0xff]  ;;  %v108_v40 = vld [vmem:[%s1558_s1 + $0x278] sm:$0xff] }
  0x53   :  { %451 = vmatpush.msra.mxu2 %v68_v28  ;;  %465 = vmatpush.msra.mxu0 %v112_v29  ;;  %v140_v41 = vld [vmem:[%s1558_s1 + $0x378] sm:$0xff]  ;;  %v62_v42 = vld [vmem:[%s1558_s1 + $0x108] sm:$0xff] }
  0x54   :  { %433 = vmatpush.msrb.mxu3 %v32_v30  ;;  %485 = vmatpush.msra.mxu1 %v144_v31  ;;  %v186_v43 = vld [vmem:[%s1558_s1 + $0x4e8] sm:$0xff]  ;;  %v220_v44 = vld [vmem:[%s1558_s1 + $0x5f8] sm:$0xff]  ;;  %v575_v31 = vld [vmem:[%s1560_s3 + $0x70] sm:$0xff] }
  0x55   :  { %452 = vmatpush.msra.mxu2 %v66_v32  ;;  %466 = vmatpush.msra.mxu0 %v110_v33  ;;  %v106_v45 = vld [vmem:[%s1558_s1 + $0x268] sm:$0xff]  ;;  %v184_v46 = vld [vmem:[%s1558_s1 + $0x4d8] sm:$0xff] }
  0x56   :  { %434 = vmatpush.msrb.mxu3 %v30_v35  ;;  %486 = vmatpush.msra.mxu1 %v142_v36  ;;  %v138_v48 = vld [vmem:[%s1558_s1 + $0x368] sm:$0xff]  ;;  %v104_v50 = vld [vmem:[%s1558_s1 + $0x258] sm:$0xff] }
  0x57   :  { %453 = vmatpush.msra.mxu2 %v64_v37  ;;  %467 = vmatpush.msra.mxu0 %v108_v40  ;;  %v218_v49 = vld [vmem:[%s1558_s1 + $0x5e8] sm:$0xff]  ;;  %v136_v52 = vld [vmem:[%s1558_s1 + $0x358] sm:$0xff]  ;;  %v573_v40 = vld [vmem:[%s1560_s3 + $0x60] sm:$0xff] }
  0x58   :  { %499 = vmatpush.msra.mxu3 %v188_v39  ;;  %487 = vmatpush.msra.mxu1 %v140_v41  ;;  %v182_v51 = vld [vmem:[%s1558_s1 + $0x4c8] sm:$0xff]  ;;  %v216_v53 = vld [vmem:[%s1558_s1 + $0x5d8] sm:$0xff] }
  0x59   :  { %454 = vmatpush.msra.mxu2 %v62_v42  ;;  %468 = vmatpush.msra.mxu0 %v106_v45  ;;  %v102_v54 = vld [vmem:[%s1558_s1 + $0x248] sm:$0xff]  ;;  %v180_v55 = vld [vmem:[%s1558_s1 + $0x4b8] sm:$0xff] }
  0x5a   :  { %500 = vmatpush.msra.mxu3 %v186_v43  ;;  %488 = vmatpush.msra.mxu1 %v138_v48  ;;  %v214_v57 = vld [vmem:[%s1558_s1 + $0x5c8] sm:$0xff]  ;;  %v100_v58 = vld [vmem:[%s1558_s1 + $0x238] sm:$0xff]  ;;  %v571_v43 = vld [vmem:[%s1560_s3 + $0x50] sm:$0xff] }
  0x5b   :  { %519 = vmatpush.msrb.mxu2 %v220_v44  ;;  %469 = vmatpush.msra.mxu0 %v104_v50  ;;  %v178_v59 = vld [vmem:[%s1558_s1 + $0x4a8] sm:$0xff]  ;;  %v212_v62 = vld [vmem:[%s1558_s1 + $0x5b8] sm:$0xff]  ;;  %v569_v44 = vld [vmem:[%s1560_s3 + $0x40] sm:$0xff] }
  0x5c   :  { %501 = vmatpush.msra.mxu3 %v184_v46  ;;  %489 = vmatpush.msra.mxu1 %v136_v52  ;;  %v134_v60 = vld [vmem:[%s1558_s1 + $0x348] sm:$0xff]  ;;  %v176_v0 = vld [vmem:[%s1558_s1 + $0x498] sm:$0xff]  ;;  %v567_v46 = vld [vmem:[%s1560_s3 + $0x30] sm:$0xff] }
  0x5d   :  { %520 = vmatpush.msrb.mxu2 %v218_v49  ;;  %470 = vmatpush.msra.mxu0 %v102_v54  ;;  %v98_v63 = vld [vmem:[%s1558_s1 + $0x228] sm:$0xff]  ;;  %v132_v2 = vld [vmem:[%s1558_s1 + $0x338] sm:$0xff]  ;;  %v565_v48 = vld [vmem:[%s1560_s3 + $0x20] sm:$0xff] }
  0x5e   :  { %502 = vmatpush.msra.mxu3 %v182_v51  ;;  %455 = vmatmul.f32.vlgmr.msra.gmra.mxu2 %v1094_v47  ;;  %v210_v3 = vld [vmem:[%s1558_s1 + $0x5a8] sm:$0xff]  ;;  %v96_v4 = vld [vmem:[%s1558_s1 + $0x218] sm:$0xff]  ;;  %v563_v50 = vld [vmem:[%s1560_s3 + $0x10] sm:$0xff] }
  0x5f   :  { %521 = vmatpush.msrb.mxu2 %v216_v53  ;;  %471 = vmatpush.msra.mxu0 %v100_v58  ;;  %v174_v47 = vld [vmem:[%s1558_s1 + $0x488] sm:$0xff]  ;;  %v208_v6 = vld [vmem:[%s1558_s1 + $0x598] sm:$0xff]  ;;  %v561_v52 = vld [vmem:[%s1560_s3] sm:$0xff] }
  0x60   :  { %503 = vmatpush.msra.mxu3 %v180_v55  ;;  %490 = vmatpush.msra.mxu1 %v134_v60  ;;  %v130_v5 = vld [vmem:[%s1558_s1 + $0x328] sm:$0xff]  ;;  %v172_v8 = vld [vmem:[%s1558_s1 + $0x478] sm:$0xff]  ;;  %v591_v54 = vld [vmem:[%s1560_s3 + $0xf0] sm:$0xff] }
  0x61   :  { %522 = vmatpush.msrb.mxu2 %v214_v57  ;;  %472 = vmatpush.msra.mxu0 %v98_v63  ;;  %v94_v7 = vld [vmem:[%s1558_s1 + $0x208] sm:$0xff]  ;;  %v244_v9 = vld [vmem:[%s1558_s1 + $0x6b8] sm:$0xf]  ;;  %v589_v57 = vld [vmem:[%s1560_s3 + $0xe0] sm:$0xff] }
  0x62   :  { %504 = vmatpush.msra.mxu3 %v178_v59  ;;  %491 = vmatpush.msra.mxu1 %v132_v2  ;;  %v206_v10 = vld [vmem:[%s1558_s1 + $0x588] sm:$0xff]  ;;  %v204_v13 = vld [vmem:[%s1558_s1 + $0x578] sm:$0xff]  ;;  %v245_v58 = vld [vmem:[%s1559_s2] sm:$0x3]  ;;  %s676_s2 = sshll.u32 %s1564_s7, 4  ;;  %s677_s2 = int_to_ptr.hbm [resolvable:$true] %s676_s2 }
  0x63   :  { %523 = vmatpush.msrb.mxu2 %v212_v62  ;;  %473 = vmatpush.msra.mxu0 %v96_v4  ;;  %v170_v11 = vld [vmem:[%s1558_s1 + $0x468] sm:$0xff]  ;;  %v128_v14 = vld [vmem:[%s1558_s1 + $0x318] sm:$0xff]  ;;  %v587_v60 = vld [vmem:[%s1560_s3 + $0xd0] sm:$0xff]  ;;  %v247_v62 = vperm.slane %v245_v58, 0 }
  0x64   :  { %505 = vmatpush.msra.mxu3 %v176_v0  ;;  %492 = vmatpush.msra.mxu1 %v130_v5  ;;  %v242_v12 = vld [vmem:[%s1558_s1 + $0x6a8] sm:$0xff]  ;;  %v168_v15 = vld [vmem:[%s1558_s1 + $0x458] sm:$0xff] }
  0x65   :  { %524 = vmatpush.msrb.mxu2 %v210_v3  ;;  %474 = vmatpush.msra.mxu0 %v94_v7  ;;  %v240_v16 = vld [vmem:[%s1558_s1 + $0x698] sm:$0xff]  ;;  %v202_v17 = vld [vmem:[%s1558_s1 + $0x568] sm:$0xff] }
  0x66   :  { %506 = vmatpush.msra.mxu3 %v174_v47  ;;  %v166_v18 = vld [vmem:[%s1558_s1 + $0x448] sm:$0xff]  ;;  %493 = vmatpush.msra.mxu1 %v128_v14  ;;  %v164_v21 = vld [vmem:[%s1558_s1 + $0x438] sm:$0xff] }
  0x67   :  { %525 = vmatpush.msrb.mxu2 %v208_v6  ;;  %687 = vmatpush.msk.msrb.mxu0 %vm272_vm0, %v244_v9  ;;  %v238_v19 = vld [vmem:[%s1558_s1 + $0x688] sm:$0xff]  ;;  %v236_v22 = vld [vmem:[%s1558_s1 + $0x678] sm:$0xff] }
  0x68   :  { %507 = vmatpush.msra.mxu3 %v172_v8  ;;  %v126_v20 = vld [vmem:[%s1558_s1 + $0x308] sm:$0xff]  ;;  %475 = vmatmul.f32.vlgmr.msra.gmra.mxu0 %v1031_v26  ;;  %v196_v26 = vld [vmem:[%s1558_s1 + $0x538] sm:$0xff] }
  0x69   :  { %526 = vmatpush.msrb.mxu2 %v206_v10  ;;  %435 = vmatmul.f32.vlgmr.msrb.gmra.mxu3 %v1055_v34  ;;  %v200_v34 = vld [vmem:[%s1558_s1 + $0x558] sm:$0xff]  ;;  %v198_v23 = vld [vmem:[%s1558_s1 + $0x548] sm:$0xff] }
  0x6a   :  { %508 = vmatpush.msra.mxu3 %v170_v11  ;;  %544 = vmatpush.msrb.mxu0 %v242_v12  ;;  %v162_v24 = vld [vmem:[%s1558_s1 + $0x428] sm:$0xff]  ;;  %v576_v27 = vld [vmem:[%s1560_s3 + $0x78] sm:$0xff] }
  0x6b   :  { %527 = vmatpush.msrb.mxu2 %v204_v13  ;;  %v234_v25 = vld [vmem:[%s1558_s1 + $0x668] sm:$0xff]  ;;  %494 = vmatpush.msra.mxu1 %v126_v20  ;;  %v160_v28 = vld [vmem:[%s1558_s1 + $0x418] sm:$0xff]  ;;  %v579_v20 = vld [vmem:[%s1560_s3 + $0x90] sm:$0xff] }
  0x6c   :  { %509 = vmatpush.msra.mxu3 %v168_v15  ;;  %545 = vmatpush.msrb.mxu0 %v240_v16  ;;  %v232_v29 = vld [vmem:[%s1558_s1 + $0x658] sm:$0xff]  ;;  %v194_v30 = vld [vmem:[%s1558_s1 + $0x528] sm:$0xff]  ;;  %v585_v15 = vld [vmem:[%s1560_s3 + $0xc0] sm:$0xff] }
  0x6d   :  { %528 = vmatpush.msrb.mxu2 %v202_v17  ;;  %495 = vmatmul.f32.vlgmr.msra.gmra.mxu1 %v1066_v38  ;;  %v158_v32 = vld [vmem:[%s1558_s1 + $0x408] sm:$0xff]  ;;  %v192_v38 = vld [vmem:[%s1558_s1 + $0x518] sm:$0xff]  ;;  %v583_v17 = vld [vmem:[%s1560_s3 + $0xb0] sm:$0xff] }
  0x6e   :  { %510 = vmatpush.msra.mxu3 %v166_v18  ;;  %546 = vmatpush.msrb.mxu0 %v238_v19  ;;  %v230_v33 = vld [vmem:[%s1558_s1 + $0x648] sm:$0xff]  ;;  %v228_v35 = vld [vmem:[%s1558_s1 + $0x638] sm:$0xff]  ;;  %v581_v19 = vld [vmem:[%s1560_s3 + $0xa0] sm:$0xff] }
  0x6f   :  { %529 = vmatpush.msrb.mxu2 %v200_v34  ;;  %597 = vmatpush.msrb.mxu1 %v576_v27  ;;  %v574_v36 = vld [vmem:[%s1560_s3 + $0x68] sm:$0xff]  ;;  %v224_v41 = vld [vmem:[%s1558_s1 + $0x618] sm:$0xff] }
  0x70   :  { %511 = vmatpush.msra.mxu3 %v164_v21  ;;  %547 = vmatpush.msrb.mxu0 %v236_v22  ;;  %v190_v37 = vld [vmem:[%s1558_s1 + $0x508] sm:$0xff]  ;;  %v568_v45 = vld [vmem:[%s1560_s3 + $0x38] sm:$0xff]  ;;  %v577_v22 = vld [vmem:[%s1560_s3 + $0x80] sm:$0xff] }
  0x71   :  { %530 = vmatpush.msrb.mxu2 %v198_v23  ;;  %598 = vmatpush.msrb.mxu1 %v575_v31  ;;  %v226_v39 = vld [vmem:[%s1558_s1 + $0x628] sm:$0xff]  ;;  %v564_v49 = vld [vmem:[%s1560_s3 + $0x18] sm:$0xff]  ;;  %v248_v23 = vperm.slane %v245_v58, 1 }
  0x72   :  { %512 = vmatpush.msra.mxu3 %v162_v24  ;;  %548 = vmatpush.msrb.mxu0 %v234_v25  ;;  %v222_v42 = vld [vmem:[%s1558_s1 + $0x608] sm:$0xff]  ;;  %v592_v53 = vld [vmem:[%s1560_s3 + $0xf8] sm:$0xff] }
  0x73   :  { %531 = vmatpush.msrb.mxu2 %v196_v26  ;;  %599 = vmatpush.msrb.mxu1 %v574_v36  ;;  %v562_v51 = vld [vmem:[%s1560_s3 + $0x8] sm:$0xff]  ;;  %v588_v59 = vld [vmem:[%s1560_s3 + $0xd8] sm:$0xff] }
  0x74   :  { %513 = vmatpush.msra.mxu3 %v160_v28  ;;  %549 = vmatpush.msrb.mxu0 %v232_v29  ;;  %v590_v55 = vld [vmem:[%s1560_s3 + $0xe8] sm:$0xff]  ;;  %v584_v16 = vld [vmem:[%s1560_s3 + $0xb8] sm:$0xff] }
  0x75   :  { %532 = vmatpush.msrb.mxu2 %v194_v30  ;;  %600 = vmatpush.msrb.mxu1 %v573_v40  ;;  %v586_v0 = vld [vmem:[%s1560_s3 + $0xc8] sm:$0xff]  ;;  %v580_v34 = vld [vmem:[%s1560_s3 + $0x98] sm:$0xff]  ;;  %v638_v40 = vld [vmem:[%s1562_s5] sm:$0xff] }
  0x76   :  { %514 = vmatpush.msra.mxu3 %v158_v32  ;;  %550 = vmatpush.msrb.mxu0 %v230_v33  ;;  %v582_v18 = vld [vmem:[%s1560_s3 + $0xa8] sm:$0xff] }
  0x77   :  { %533 = vmatpush.msrb.mxu2 %v192_v38  ;;  %515 = vmatmul.f32.vlgmr.msra.gmra.mxu3 %v1137_v61  ;;  %v572_v61 = vld [vmem:[%s1560_s3 + $0x58] sm:$0xff]  ;;  %v578_v21 = vld [vmem:[%s1560_s3 + $0x88] sm:$0xff] }
  0x78   :  { %551 = vmatpush.msrb.mxu0 %v228_v35  ;;  %601 = vmatpush.msrb.mxu1 %v572_v61 }
  0x79   :  { %534 = vmatpush.msrb.mxu2 %v190_v37  ;;  %617 = vmatpush.msrb.mxu3 %v592_v53 }
  0x7a   :  { %535 = vmatmul.f32.vlgmr.msrb.gmra.mxu2 %v1148_v1  ;;  %552 = vmatpush.msrb.mxu0 %v226_v39  ;;  %v570_v1 = vld [vmem:[%s1560_s3 + $0x48] sm:$0xff] }
  0x7b   :  { %602 = vmatpush.msrb.mxu1 %v571_v43  ;;  %618 = vmatpush.msrb.mxu3 %v591_v54 }
  0x7c   :  { %553 = vmatpush.msrb.mxu0 %v224_v41  ;;  %v691_v41 = vld [vmem:[%s1561_s4] ss:$0 sm:$0xff] }
  0x7d   :  { %603 = vmatpush.msrb.mxu1 %v570_v1  ;;  %619 = vmatpush.msrb.mxu3 %v590_v55 }
  0x7e   :  { %554 = vmatpush.msrb.mxu0 %v222_v42 }
  0x7f   :  { %688 = vmatmul.msk.f32.vlgmr.msrb.gmra.mxu0 %vm269_vm1, %v1121_v56  ;;  %604 = vmatpush.msrb.mxu1 %v569_v44  ;;  %v566_v56 = vld [vmem:[%s1560_s3 + $0x28] sm:$0xff] }
  0x80   :  { %620 = vmatpush.msrb.mxu3 %v589_v57  ;;  %662 = vmatpush.msra.mxu0 %v638_v40 }
  0x81   :  { %605 = vmatpush.msrb.mxu1 %v568_v45  ;;  %v692_v45 = vld [vmem:[%s1563_s6] ss:$0 sm:$0xff] }
  0x82   :  { %621 = vmatpush.msrb.mxu3 %v588_v59 }
  0x83   :  { %606 = vmatpush.msrb.mxu1 %v567_v46 }
  0x84   :  { %622 = vmatpush.msrb.mxu3 %v587_v60 }
  0x85   :  { %607 = vmatpush.msrb.mxu1 %v566_v56 }
  0x86   :  { %623 = vmatpush.msrb.mxu3 %v586_v0 }
  0x87   :  { %608 = vmatpush.msrb.mxu1 %v565_v48 }
  0x88   :  { %624 = vmatpush.msrb.mxu3 %v585_v15 }
  0x89   :  { %609 = vmatpush.msrb.mxu1 %v564_v49 }
  0x8a   :  { %625 = vmatpush.msrb.mxu3 %v584_v16 }
  0x8b   :  { %610 = vmatpush.msrb.mxu1 %v563_v50 }
  0x8c   :  { %626 = vmatpush.msrb.mxu3 %v583_v17 }
  0x8d   :  { %611 = vmatpush.msrb.mxu1 %v562_v51 }
  0x8e   :  { %627 = vmatpush.msrb.mxu3 %v582_v18 }
  0x8f   :  { %612 = vmatpush.msrb.mxu1 %v561_v52 }
  0x90   :  { %628 = vmatpush.msrb.mxu3 %v581_v19 }
  0x92   :  { %629 = vmatpush.msrb.mxu3 %v580_v34 }
  0x94   :  { %630 = vmatpush.msrb.mxu3 %v579_v20 }
  0x96   :  { %631 = vmatpush.msrb.mxu3 %v578_v21 }
  0x98   :  { %632 = vmatpush.msrb.mxu3 %v577_v22 }
  0xb2   :  { %v336_v4 = vpop.f32.mrf.mxu2 }
  0xb3   :  { %v296_v63 = vpop.f32.mrf.mxu0 }
  0xb4   :  { %v297_v2 = vadd.f32 %v296_v63, %v247_v62 }
  0xb6   :  { %v356_v5 = vpop.f32.mrf.mxu3 }
  0xba   :  { %v316_v3 = vpop.f32.mrf.mxu1 }
  0xbb   :  { %v317_v47 = vadd.f32 %v316_v3, %v297_v2 }
  0xbd   :  { %v337_v6 = vadd.f32 %v336_v4, %v317_v47 }
  0xbf   :  { %v357_v7 = vadd.f32 %v356_v5, %v337_v6 }
  0xc1   :  { %v376_v8 = vpop.f32.mrf.mxu0 }
  0xc2   :  { %v377_v9 = vadd.f32 %v376_v8, %v357_v7 }
  0xc3   :  { %v396_v10 = vpop.f32.mrf.mxu1 }
  0xc4   :  { %v397_v11 = vadd.f32 %v396_v10, %v377_v9  ;;  %v416_v12 = vpop.f32.mrf.mxu2 }
  0xc6   :  { %v417_v13 = vadd.f32 %v416_v12, %v397_v11 }
  0xc8   :  { %v559_v14 = vmax.f32 %v417_v13, 0.0 }
  0xca   :  { %613 = vmatmul.f32.vlgmr.msrb.gmra.mxu1 %v559_v14 }
  0xe1   :  { %v456_v25 = vpop.f32.mrf.mxu2 }
  0xe5   :  { %v476_v28 = vpop.f32.mrf.mxu0 }
  0xea   :  { %v496_v30 = vpop.f32.mrf.mxu1 }
  0xec   :  { %v436_v24 = vpop.f32.mrf.mxu3 }
  0xed   :  { %v437_v26 = vadd.f32 %v436_v24, %v248_v23 }
  0xef   :  { %v457_v27 = vadd.f32 %v456_v25, %v437_v26 }
  0xf1   :  { %v477_v29 = vadd.f32 %v476_v28, %v457_v27 }
  0xf3   :  { %v497_v31 = vadd.f32 %v496_v30, %v477_v29 }
  0xfa   :  { %v516_v32 = vpop.f32.mrf.mxu3 }
  0xfb   :  { %v517_v33 = vadd.f32 %v516_v32, %v497_v31 }
  0xfc   :  { %v556_v35 = vpop.f32.mrf.mxu0 }
  0xfd   :  { %v536_v38 = vpop.f32.mrf.mxu2 }
  0xfe   :  { %v537_v36 = vadd.f32 %v536_v38, %v517_v33 }
 0x100   :  { %v557_v37 = vadd.f32 %v556_v35, %v537_v36 }
 0x102   :  { %v560_v39 = vmax.f32 %v557_v37, 0.0 }
 0x104   :  { %633 = vmatmul.f32.vlgmr.msrb.gmra.mxu3 %v560_v39 }
 0x147   :  { %v614_v61 = vpop.f32.mrf.mxu1 }
 0x148   :  { %v615_v42 = vadd.f32 %v691_v41, %v614_v61 }
 0x187   :  { %v634_v43 = vpop.f32.mrf.mxu3 }
 0x188   :  { %v635_v1 = vadd.f32 %v634_v43, %v615_v42 }
 0x18a   :  { %v637_v44 = vmax.f32 %v635_v1, 0.0 }
 0x18c   :  { %689 = vmatmul.msk.f32.vlgmr.msra.gmra.mxu0 %vm643_vm2, %v637_v44 }
 0x209   :  { %v664_v46 = vpop.f32.mrf.mxu0 }
 0x20a   :  { %v665_v56 = vadd.f32 %v692_v45, %v664_v46 }
 0x20c   :  { %668 = vst.msk [vmem:[#allocation2] sm:$0x3] %vm667_vm3, %v665_v56 }
 0x20d   :  { %679 = dma.vmem_to_hbm [thread:$0]  %s675_s30, 32, %s677_s2, [#allocation3]  }
 0x20e   :  { %717 = dma.done.wait [#allocation3], 32  }
 0x20f   :  { %718 = vsyncadd [#allocation3], 4294967264 }
 0x210   :  { %684 = vsyncpa [#allocation3], 1 }

</bundles_post_ra>
